<compile_context>
chip_gen: v7x
topology: tpu7x:2x2x1
jax: 0.10.0
libtpu: 0.0.40
codegen_flags: <defaults>
</compile_context>

<pallas_src>
import functools

import numpy as np
import jax
import jax.numpy as jnp
from jax import lax
from jax.experimental import pallas as pl
from jax.experimental.pallas import tpu as pltpu

BN_EPS = 1e-5


def _down_kernel(x_ref, w1_ref, s1_ref, b1_ref, w2_ref, s2_ref, b2_ref,
                 o_ref, pad1, pad2, *, Hh, Wh, Cin, Cout, cdt):
    # Zero the halo scratch once; the interior is fully overwritten every step,
    # so the zero border persists across grid iterations.
    @pl.when(pl.program_id(0) == 0)
    def _init():
        pad1[...] = jnp.zeros_like(pad1)
        pad2[...] = jnp.zeros_like(pad2)

    # ---- 2x2 max pool, reduced in-kernel from a single input stream ----
    # x_ref block: (1, 4, Hh, Wh, Cin); axis 1 enumerates the window corners.
    pooled = jnp.maximum(jnp.maximum(x_ref[0, 0], x_ref[0, 1]),
                         jnp.maximum(x_ref[0, 2], x_ref[0, 3]))  # (Hh, Wh, Cin)

    def conv3x3_bn_relu(pad_ref, src, C, w_ref, s_ref, b_ref):
        # src: (Hh, Wh, C) f32.  SAME padding via the zero halo of pad_ref.
        pad_ref[1:Hh + 1, 1:Wh + 1, :] = src
        # im2col: (Hh*Wh, 9*C) patch matrix, single MXU matmul.
        cols = [pad_ref[dy:dy + Hh, dx:dx + Wh, :].reshape(Hh * Wh, C)
                for dy in range(3) for dx in range(3)]
        patches = jnp.concatenate(cols, axis=-1).astype(cdt)   # (Hh*Wh, 9*C)
        acc = jnp.dot(patches, w_ref[...],
                      preferred_element_type=jnp.float32)      # (Hh*Wh, Cout)
        # Folded BatchNorm (eval stats) + ReLU in f32.
        return jnp.maximum(acc * s_ref[0] + b_ref[0], 0.0)

    y1 = conv3x3_bn_relu(pad1, pooled, Cin, w1_ref, s1_ref, b1_ref)
    y2 = conv3x3_bn_relu(pad2, y1.reshape(Hh, Wh, Cout), Cout,
                         w2_ref, s2_ref, b2_ref)
    o_ref[0] = y2.reshape(Hh, Wh, Cout).astype(o_ref.dtype)


def down_pallas(x_nchw, params, compute_dtype=jnp.bfloat16):
    """x_nchw: (N, Cin, H, W) float32 -> (N, Cout, H//2, W//2) float32."""
    w1, s1, b1, w2, s2, b2 = params
    N, Cin, H, W = x_nchw.shape
    assert H % 2 == 0 and W % 2 == 0, "MaxPool2d(2) path here assumes even H, W"
    Hh, Wh = H // 2, W // 2
    Cout = w1.shape[-1]

    # Single fused rearrange (one HBM pass): NCHW -> (N, 4, Hh, Wh, Cin),
    # axis 1 = the 2x2 pool-window corners.  Replaces the previous
    # NCHW->NHWC transpose PLUS the 4-way strided pre-slice pass.
    x = jnp.transpose(x_nchw.reshape(N, Cin, Hh, 2, Wh, 2),
                      (0, 3, 5, 2, 4, 1)).reshape(N, 4, Hh, Wh, Cin)

    # im2col-flattened weights, (dy, dx, cin)-major rows; bf16 for the MXU.
    w1f = w1.reshape(9 * Cin, Cout).astype(compute_dtype)
    w2f = w2.reshape(9 * Cout, Cout).astype(compute_dtype)
    s1_2d = s1.reshape(1, Cout).astype(jnp.float32)
    b1_2d = b1.reshape(1, Cout).astype(jnp.float32)
    s2_2d = s2.reshape(1, Cout).astype(jnp.float32)
    b2_2d = b2.reshape(1, Cout).astype(jnp.float32)

    vec_spec = pl.BlockSpec((1, Cout), lambda n: (0, 0))
    kernel = functools.partial(_down_kernel, Hh=Hh, Wh=Wh, Cin=Cin, Cout=Cout,
                               cdt=compute_dtype)

    out = pl.pallas_call(
        kernel,
        out_shape=jax.ShapeDtypeStruct((N, Hh, Wh, Cout), jnp.float32),
        grid_spec=pltpu.PrefetchScalarGridSpec(
            num_scalar_prefetch=0,
            grid=(N,),
            in_specs=[
                pl.BlockSpec((1, 4, Hh, Wh, Cin), lambda n: (n, 0, 0, 0, 0)),
                pl.BlockSpec((9 * Cin, Cout), lambda n: (0, 0)),
                vec_spec, vec_spec,
                pl.BlockSpec((9 * Cout, Cout), lambda n: (0, 0)),
                vec_spec, vec_spec,
            ],
            out_specs=pl.BlockSpec((1, Hh, Wh, Cout), lambda n: (n, 0, 0, 0)),
            scratch_shapes=[
                pltpu.VMEM((Hh + 2, Wh + 2, Cin), jnp.float32),
                pltpu.VMEM((Hh + 2, Wh + 2, Cout), jnp.float32),
            ],
        ),
        compiler_params=pltpu.CompilerParams(
            dimension_semantics=("parallel",)),
    )(x, w1f, s1_2d, b1_2d, w2f, s2_2d, b2_2d)

    # TODO(synk): for realistic U-Net resolutions add a spatial row-tile grid
    # axis (1-row halo per tile) so blocks fit v7x's 64 MiB VMEM and the
    # pipeline has enough steps; at this toy size one plane per step is fine.
    # The NCHW transpose below is interface glue for the PyTorch module; in an
    # NHWC pipeline it (and the rearrange above) would disappear.
    return jnp.transpose(out, (0, 3, 1, 2))


def init_params(key, in_ch, out_ch):
    """Deterministic synthetic parameters; BatchNorm (eval mode) folded into
    a per-channel scale/bias applied after each conv."""
    ks = jax.random.split(key, 12)

    def bn_fold(conv_b, gamma, beta, mean, var):
        s = gamma / jnp.sqrt(var + BN_EPS)
        return s, s * (conv_b - mean) + beta

    # conv1 / bn1
    w1 = 0.1 * jax.random.normal(ks[0], (3, 3, in_ch, out_ch), jnp.float32)  # HWIO
    cb1 = 0.1 * jax.random.normal(ks[1], (out_ch,), jnp.float32)
    g1 = 1.0 + 0.1 * jax.random.normal(ks[2], (out_ch,), jnp.float32)
    be1 = 0.1 * jax.random.normal(ks[3], (out_ch,), jnp.float32)
    m1 = 0.1 * jax.random.normal(ks[4], (out_ch,), jnp.float32)
    v1 = 0.9 + 0.2 * jax.random.uniform(ks[5], (out_ch,), jnp.float32)
    s1, b1 = bn_fold(cb1, g1, be1, m1, v1)

    # conv2 / bn2
    w2 = 0.1 * jax.random.normal(ks[6], (3, 3, out_ch, out_ch), jnp.float32)
    cb2 = 0.1 * jax.random.normal(ks[7], (out_ch,), jnp.float32)
    g2 = 1.0 + 0.1 * jax.random.normal(ks[8], (out_ch,), jnp.float32)
    be2 = 0.1 * jax.random.normal(ks[9], (out_ch,), jnp.float32)
    m2 = 0.1 * jax.random.normal(ks[10], (out_ch,), jnp.float32)
    v2 = 0.9 + 0.2 * jax.random.uniform(ks[11], (out_ch,), jnp.float32)
    s2, b2 = bn_fold(cb2, g2, be2, m2, v2)

    return (w1, s1, b1, w2, s2, b2)


def down_reference(x_nchw, params):
    """Pure-JAX f32 reference (NHWC internally) for correctness checking."""
    w1, s1, b1, w2, s2, b2 = params
    x = jnp.transpose(x_nchw, (0, 2, 3, 1))
    pooled = jnp.maximum(
        jnp.maximum(x[:, 0::2, 0::2, :], x[:, 0::2, 1::2, :]),
        jnp.maximum(x[:, 1::2, 0::2, :], x[:, 1::2, 1::2, :]))

    def conv_bn_relu(h, w, s, b):
        y = lax.conv_general_dilated(
            h, w, window_strides=(1, 1), padding="SAME",
            dimension_numbers=("NHWC", "HWIO", "NHWC"))
        return jnp.maximum(y * s + b, 0.0)

    y = conv_bn_relu(pooled, w1, s1, b1)
    y = conv_bn_relu(y, w2, s2, b2)
    return jnp.transpose(y, (0, 3, 1, 2))


if __name__ == "__main__":
    # TODO(synk): BatchNorm is implemented in eval mode (folded running stats);
    # PyTorch training-mode batch statistics are not computed in-kernel.
    key = jax.random.PRNGKey(0)
    k_x, k_p = jax.random.split(key)

    N, in_ch, out_ch, H, W = 2, 4, 8, 16, 16
    x = jax.random.normal(k_x, (N, in_ch, H, W), jnp.float32)
    params = init_params(k_p, in_ch, out_ch)

    ref = down_reference(x, params)

    # Exact-arithmetic path (f32 operands): tight tolerance vs. f32 reference.
    out_f32 = jax.block_until_ready(
        down_pallas(x, params, compute_dtype=jnp.float32))
    assert out_f32.shape == (N, out_ch, H // 2, W // 2), out_f32.shape
    np.testing.assert_allclose(np.asarray(out_f32), np.asarray(ref),
                               rtol=1e-4, atol=1e-4)

    # Fast path (bf16 MXU operands, f32 accumulate): bf16-level tolerance.
    out_bf16 = jax.block_until_ready(
        down_pallas(x, params, compute_dtype=jnp.bfloat16))
    assert out_bf16.shape == (N, out_ch, H // 2, W // 2), out_bf16.shape
    np.testing.assert_allclose(np.asarray(out_bf16), np.asarray(ref),
                               rtol=5e-2, atol=5e-2)

    print("KERNEL_OK")
</pallas_src>

<mosaic_0001>
module attributes {stable_mosaic.version = 11 : i64} {
  func.func @_down_kernel(%arg0: i32, %arg1: memref<1x4x8x8x4xf32, #tpu.memory_space<vmem>>, %arg2: memref<36x8xf32, #tpu.memory_space<vmem>>, %arg3: memref<1x8xf32, #tpu.memory_space<vmem>>, %arg4: memref<1x8xf32, #tpu.memory_space<vmem>>, %arg5: memref<72x8xf32, #tpu.memory_space<vmem>>, %arg6: memref<1x8xf32, #tpu.memory_space<vmem>>, %arg7: memref<1x8xf32, #tpu.memory_space<vmem>>, %arg8: memref<1x8x8x8xf32, #tpu.memory_space<vmem>>, %arg9: memref<10x10x4xf32, #tpu.memory_space<vmem>>, %arg10: memref<10x10x8xf32, #tpu.memory_space<vmem>>) attributes {dimension_semantics = [#tpu.dimension_semantics<parallel>], iteration_bounds = array<i64: 2>, scalar_prefetch = 0 : i64, scratch_operands = 2 : i64, tpu.core_type = #tpu.core_type<tc>, window_params = [{transform_indices = @transform_0, window_bounds = array<i64: 1, 4, 8, 8, 4>}, {pipeline_mode = #tpu.pipeline_mode<synchronous>, transform_indices = @transform_1, window_bounds = array<i64: 36, 8>}, {pipeline_mode = #tpu.pipeline_mode<synchronous>, transform_indices = @transform_2, window_bounds = array<i64: 1, 8>}, {pipeline_mode = #tpu.pipeline_mode<synchronous>, transform_indices = @transform_3, window_bounds = array<i64: 1, 8>}, {pipeline_mode = #tpu.pipeline_mode<synchronous>, transform_indices = @transform_4, window_bounds = array<i64: 72, 8>}, {pipeline_mode = #tpu.pipeline_mode<synchronous>, transform_indices = @transform_5, window_bounds = array<i64: 1, 8>}, {pipeline_mode = #tpu.pipeline_mode<synchronous>, transform_indices = @transform_6, window_bounds = array<i64: 1, 8>}, {transform_indices = @transform_7, window_bounds = array<i64: 1, 8, 8, 8>}]} {
    %c0_i32 = arith.constant 0 : i32
    %0 = arith.cmpi eq, %arg0, %c0_i32 : i32
    %1 = arith.extui %0 : i1 to i32
    %c0_i32_0 = arith.constant 0 : i32
    %2 = arith.cmpi ne, %1, %c0_i32_0 : i32
    scf.if %2 {
      %cst_96 = arith.constant 0.000000e+00 : f32
      %87 = vector.broadcast %cst_96 : f32 to vector<10x10x4xf32>
      %c0_97 = arith.constant 0 : index
      %c0_98 = arith.constant 0 : index
      %c0_99 = arith.constant 0 : index
      %88 = vector.load %arg9[%c0_97, %c0_98, %c0_99] : memref<10x10x4xf32, #tpu.memory_space<vmem>>, vector<10x10x4xf32>
      tpu.vector_store %arg9[%c0_97, %c0_98, %c0_99], %87 {strides = array<i32>} : memref<10x10x4xf32, #tpu.memory_space<vmem>>, vector<10x10x4xf32>,
      %cst_100 = arith.constant 0.000000e+00 : f32
      %89 = vector.broadcast %cst_100 : f32 to vector<10x10x8xf32>
      %c0_101 = arith.constant 0 : index
      %c0_102 = arith.constant 0 : index
      %c0_103 = arith.constant 0 : index
      %90 = vector.load %arg10[%c0_101, %c0_102, %c0_103] : memref<10x10x8xf32, #tpu.memory_space<vmem>>, vector<10x10x8xf32>
      tpu.vector_store %arg10[%c0_101, %c0_102, %c0_103], %89 {strides = array<i32>} : memref<10x10x8xf32, #tpu.memory_space<vmem>>, vector<10x10x8xf32>,
    } else {
    }
    %c0 = arith.constant 0 : index
    %c0_1 = arith.constant 0 : index
    %c0_2 = arith.constant 0 : index
    %c0_3 = arith.constant 0 : index
    %c0_4 = arith.constant 0 : index
    %3 = vector.load %arg1[%c0, %c0_1, %c0_2, %c0_3, %c0_4] : memref<1x4x8x8x4xf32, #tpu.memory_space<vmem>>, vector<1x1x8x8x4xf32>
    %4 = vector.shape_cast %3 : vector<1x1x8x8x4xf32> to vector<8x8x4xf32>
    %c0_5 = arith.constant 0 : index
    %c1 = arith.constant 1 : index
    %c0_6 = arith.constant 0 : index
    %c0_7 = arith.constant 0 : index
    %c0_8 = arith.constant 0 : index
    %5 = vector.load %arg1[%c0_5, %c1, %c0_6, %c0_7, %c0_8] : memref<1x4x8x8x4xf32, #tpu.memory_space<vmem>>, vector<1x1x8x8x4xf32>
    %6 = vector.shape_cast %5 : vector<1x1x8x8x4xf32> to vector<8x8x4xf32>
    %7 = arith.maximumf %4, %6 : vector<8x8x4xf32>
    %c0_9 = arith.constant 0 : index
    %c2 = arith.constant 2 : index
    %c0_10 = arith.constant 0 : index
    %c0_11 = arith.constant 0 : index
    %c0_12 = arith.constant 0 : index
    %8 = vector.load %arg1[%c0_9, %c2, %c0_10, %c0_11, %c0_12] : memref<1x4x8x8x4xf32, #tpu.memory_space<vmem>>, vector<1x1x8x8x4xf32>
    %9 = vector.shape_cast %8 : vector<1x1x8x8x4xf32> to vector<8x8x4xf32>
    %c0_13 = arith.constant 0 : index
    %c3 = arith.constant 3 : index
    %c0_14 = arith.constant 0 : index
    %c0_15 = arith.constant 0 : index
    %c0_16 = arith.constant 0 : index
    %10 = vector.load %arg1[%c0_13, %c3, %c0_14, %c0_15, %c0_16] : memref<1x4x8x8x4xf32, #tpu.memory_space<vmem>>, vector<1x1x8x8x4xf32>
    %11 = vector.shape_cast %10 : vector<1x1x8x8x4xf32> to vector<8x8x4xf32>
    %12 = arith.maximumf %9, %11 : vector<8x8x4xf32>
    %13 = arith.maximumf %7, %12 : vector<8x8x4xf32>
    %c1_17 = arith.constant 1 : index
    %c1_18 = arith.constant 1 : index
    %c0_19 = arith.constant 0 : index
    %14 = vector.load %arg9[%c1_17, %c1_18, %c0_19] : memref<10x10x4xf32, #tpu.memory_space<vmem>>, vector<8x8x4xf32>
    tpu.vector_store %arg9[%c1_17, %c1_18, %c0_19], %13 {strides = array<i32>} : memref<10x10x4xf32, #tpu.memory_space<vmem>>, vector<8x8x4xf32>,
    %c0_20 = arith.constant 0 : index
    %c0_21 = arith.constant 0 : index
    %c0_22 = arith.constant 0 : index
    %15 = vector.load %arg9[%c0_20, %c0_21, %c0_22] : memref<10x10x4xf32, #tpu.memory_space<vmem>>, vector<8x8x4xf32>
    %16 = vector.shape_cast %15 : vector<8x8x4xf32> to vector<64x4xf32>
    %c0_23 = arith.constant 0 : index
    %c1_24 = arith.constant 1 : index
    %c0_25 = arith.constant 0 : index
    %17 = vector.load %arg9[%c0_23, %c1_24, %c0_25] : memref<10x10x4xf32, #tpu.memory_space<vmem>>, vector<8x8x4xf32>
    %18 = vector.shape_cast %17 : vector<8x8x4xf32> to vector<64x4xf32>
    %c0_26 = arith.constant 0 : index
    %c2_27 = arith.constant 2 : index
    %c0_28 = arith.constant 0 : index
    %19 = vector.load %arg9[%c0_26, %c2_27, %c0_28] : memref<10x10x4xf32, #tpu.memory_space<vmem>>, vector<8x8x4xf32>
    %20 = vector.shape_cast %19 : vector<8x8x4xf32> to vector<64x4xf32>
    %c1_29 = arith.constant 1 : index
    %c0_30 = arith.constant 0 : index
    %c0_31 = arith.constant 0 : index
    %21 = vector.load %arg9[%c1_29, %c0_30, %c0_31] : memref<10x10x4xf32, #tpu.memory_space<vmem>>, vector<8x8x4xf32>
    %22 = vector.shape_cast %21 : vector<8x8x4xf32> to vector<64x4xf32>
    %c1_32 = arith.constant 1 : index
    %c1_33 = arith.constant 1 : index
    %c0_34 = arith.constant 0 : index
    %23 = vector.load %arg9[%c1_32, %c1_33, %c0_34] : memref<10x10x4xf32, #tpu.memory_space<vmem>>, vector<8x8x4xf32>
    %24 = vector.shape_cast %23 : vector<8x8x4xf32> to vector<64x4xf32>
    %c1_35 = arith.constant 1 : index
    %c2_36 = arith.constant 2 : index
    %c0_37 = arith.constant 0 : index
    %25 = vector.load %arg9[%c1_35, %c2_36, %c0_37] : memref<10x10x4xf32, #tpu.memory_space<vmem>>, vector<8x8x4xf32>
    %26 = vector.shape_cast %25 : vector<8x8x4xf32> to vector<64x4xf32>
    %c2_38 = arith.constant 2 : index
    %c0_39 = arith.constant 0 : index
    %c0_40 = arith.constant 0 : index
    %27 = vector.load %arg9[%c2_38, %c0_39, %c0_40] : memref<10x10x4xf32, #tpu.memory_space<vmem>>, vector<8x8x4xf32>
    %28 = vector.shape_cast %27 : vector<8x8x4xf32> to vector<64x4xf32>
    %c2_41 = arith.constant 2 : index
    %c1_42 = arith.constant 1 : index
    %c0_43 = arith.constant 0 : index
    %29 = vector.load %arg9[%c2_41, %c1_42, %c0_43] : memref<10x10x4xf32, #tpu.memory_space<vmem>>, vector<8x8x4xf32>
    %30 = vector.shape_cast %29 : vector<8x8x4xf32> to vector<64x4xf32>
    %c2_44 = arith.constant 2 : index
    %c2_45 = arith.constant 2 : index
    %c0_46 = arith.constant 0 : index
    %31 = vector.load %arg9[%c2_44, %c2_45, %c0_46] : memref<10x10x4xf32, #tpu.memory_space<vmem>>, vector<8x8x4xf32>
    %32 = vector.shape_cast %31 : vector<8x8x4xf32> to vector<64x4xf32>
    %33 = tpu.concatenate %16, %18, %20, %22, %24, %26, %28, %30, %32 in 1 : vector<64x4xf32>, vector<64x4xf32>, vector<64x4xf32>, vector<64x4xf32>, vector<64x4xf32>, vector<64x4xf32>, vector<64x4xf32>, vector<64x4xf32>, vector<64x4xf32> -> vector<64x36xf32>
    %c0_47 = arith.constant 0 : index
    %c0_48 = arith.constant 0 : index
    %34 = vector.load %arg2[%c0_47, %c0_48] : memref<36x8xf32, #tpu.memory_space<vmem>>, vector<36x8xf32>
    %cst = arith.constant dense<0.000000e+00> : vector<64x8xf32>
    %35 = tpu.matmul %33, %34, %cst {dimension_numbers = #tpu.dot_dimension_numbers<[1], [0], [0], [1], [0, 0, 1, 1], [], []>} : vector<64x36xf32>, vector<36x8xf32>, vector<64x8xf32> -> vector<64x8xf32>
    %c0_49 = arith.constant 0 : index
    %c0_50 = arith.constant 0 : index
    %36 = vector.load %arg3[%c0_49, %c0_50] : memref<1x8xf32, #tpu.memory_space<vmem>>, vector<1x8xf32>
    %37 = vector.shape_cast %36 : vector<1x8xf32> to vector<8xf32>
    %38 = vector.shape_cast %37 : vector<8xf32> to vector<1x8xf32>
    %39 = vector.broadcast %38 : vector<1x8xf32> to vector<64x8xf32>
    %40 = arith.mulf %35, %39 : vector<64x8xf32>
    %c0_51 = arith.constant 0 : index
    %c0_52 = arith.constant 0 : index
    %41 = vector.load %arg4[%c0_51, %c0_52] : memref<1x8xf32, #tpu.memory_space<vmem>>, vector<1x8xf32>
    %42 = vector.shape_cast %41 : vector<1x8xf32> to vector<8xf32>
    %43 = vector.shape_cast %42 : vector<8xf32> to vector<1x8xf32>
    %44 = vector.broadcast %43 : vector<1x8xf32> to vector<64x8xf32>
    %45 = arith.addf %40, %44 : vector<64x8xf32>
    %cst_53 = arith.constant 0.000000e+00 : f32
    %46 = vector.broadcast %cst_53 : f32 to vector<64x8xf32>
    %47 = arith.maximumf %45, %46 : vector<64x8xf32>
    %48 = vector.shape_cast %47 : vector<64x8xf32> to vector<8x8x8xf32>
    %c1_54 = arith.constant 1 : index
    %c1_55 = arith.constant 1 : index
    %c0_56 = arith.constant 0 : index
    %49 = vector.load %arg10[%c1_54, %c1_55, %c0_56] : memref<10x10x8xf32, #tpu.memory_space<vmem>>, vector<8x8x8xf32>
    tpu.vector_store %arg10[%c1_54, %c1_55, %c0_56], %48 {strides = array<i32>} : memref<10x10x8xf32, #tpu.memory_space<vmem>>, vector<8x8x8xf32>,
    %c0_57 = arith.constant 0 : index
    %c0_58 = arith.constant 0 : index
    %c0_59 = arith.constant 0 : index
    %50 = vector.load %arg10[%c0_57, %c0_58, %c0_59] : memref<10x10x8xf32, #tpu.memory_space<vmem>>, vector<8x8x8xf32>
    %51 = vector.shape_cast %50 : vector<8x8x8xf32> to vector<64x8xf32>
    %c0_60 = arith.constant 0 : index
    %c1_61 = arith.constant 1 : index
    %c0_62 = arith.constant 0 : index
    %52 = vector.load %arg10[%c0_60, %c1_61, %c0_62] : memref<10x10x8xf32, #tpu.memory_space<vmem>>, vector<8x8x8xf32>
    %53 = vector.shape_cast %52 : vector<8x8x8xf32> to vector<64x8xf32>
    %c0_63 = arith.constant 0 : index
    %c2_64 = arith.constant 2 : index
    %c0_65 = arith.constant 0 : index
    %54 = vector.load %arg10[%c0_63, %c2_64, %c0_65] : memref<10x10x8xf32, #tpu.memory_space<vmem>>, vector<8x8x8xf32>
    %55 = vector.shape_cast %54 : vector<8x8x8xf32> to vector<64x8xf32>
    %c1_66 = arith.constant 1 : index
    %c0_67 = arith.constant 0 : index
    %c0_68 = arith.constant 0 : index
    %56 = vector.load %arg10[%c1_66, %c0_67, %c0_68] : memref<10x10x8xf32, #tpu.memory_space<vmem>>, vector<8x8x8xf32>
    %57 = vector.shape_cast %56 : vector<8x8x8xf32> to vector<64x8xf32>
    %c1_69 = arith.constant 1 : index
    %c1_70 = arith.constant 1 : index
    %c0_71 = arith.constant 0 : index
    %58 = vector.load %arg10[%c1_69, %c1_70, %c0_71] : memref<10x10x8xf32, #tpu.memory_space<vmem>>, vector<8x8x8xf32>
    %59 = vector.shape_cast %58 : vector<8x8x8xf32> to vector<64x8xf32>
    %c1_72 = arith.constant 1 : index
    %c2_73 = arith.constant 2 : index
    %c0_74 = arith.constant 0 : index
    %60 = vector.load %arg10[%c1_72, %c2_73, %c0_74] : memref<10x10x8xf32, #tpu.memory_space<vmem>>, vector<8x8x8xf32>
    %61 = vector.shape_cast %60 : vector<8x8x8xf32> to vector<64x8xf32>
    %c2_75 = arith.constant 2 : index
    %c0_76 = arith.constant 0 : index
    %c0_77 = arith.constant 0 : index
    %62 = vector.load %arg10[%c2_75, %c0_76, %c0_77] : memref<10x10x8xf32, #tpu.memory_space<vmem>>, vector<8x8x8xf32>
    %63 = vector.shape_cast %62 : vector<8x8x8xf32> to vector<64x8xf32>
    %c2_78 = arith.constant 2 : index
    %c1_79 = arith.constant 1 : index
    %c0_80 = arith.constant 0 : index
    %64 = vector.load %arg10[%c2_78, %c1_79, %c0_80] : memref<10x10x8xf32, #tpu.memory_space<vmem>>, vector<8x8x8xf32>
    %65 = vector.shape_cast %64 : vector<8x8x8xf32> to vector<64x8xf32>
    %c2_81 = arith.constant 2 : index
    %c2_82 = arith.constant 2 : index
    %c0_83 = arith.constant 0 : index
    %66 = vector.load %arg10[%c2_81, %c2_82, %c0_83] : memref<10x10x8xf32, #tpu.memory_space<vmem>>, vector<8x8x8xf32>
    %67 = vector.shape_cast %66 : vector<8x8x8xf32> to vector<64x8xf32>
    %68 = tpu.concatenate %51, %53, %55, %57, %59, %61, %63, %65, %67 in 1 : vector<64x8xf32>, vector<64x8xf32>, vector<64x8xf32>, vector<64x8xf32>, vector<64x8xf32>, vector<64x8xf32>, vector<64x8xf32>, vector<64x8xf32>, vector<64x8xf32> -> vector<64x72xf32>
    %c0_84 = arith.constant 0 : index
    %c0_85 = arith.constant 0 : index
    %69 = vector.load %arg5[%c0_84, %c0_85] : memref<72x8xf32, #tpu.memory_space<vmem>>, vector<72x8xf32>
    %cst_86 = arith.constant dense<0.000000e+00> : vector<64x8xf32>
    %70 = tpu.matmul %68, %69, %cst_86 {dimension_numbers = #tpu.dot_dimension_numbers<[1], [0], [0], [1], [0, 0, 1, 1], [], []>} : vector<64x72xf32>, vector<72x8xf32>, vector<64x8xf32> -> vector<64x8xf32>
    %c0_87 = arith.constant 0 : index
    %c0_88 = arith.constant 0 : index
    %71 = vector.load %arg6[%c0_87, %c0_88] : memref<1x8xf32, #tpu.memory_space<vmem>>, vector<1x8xf32>
    %72 = vector.shape_cast %71 : vector<1x8xf32> to vector<8xf32>
    %73 = vector.shape_cast %72 : vector<8xf32> to vector<1x8xf32>
    %74 = vector.broadcast %73 : vector<1x8xf32> to vector<64x8xf32>
    %75 = arith.mulf %70, %74 : vector<64x8xf32>
    %c0_89 = arith.constant 0 : index
    %c0_90 = arith.constant 0 : index
    %76 = vector.load %arg7[%c0_89, %c0_90] : memref<1x8xf32, #tpu.memory_space<vmem>>, vector<1x8xf32>
    %77 = vector.shape_cast %76 : vector<1x8xf32> to vector<8xf32>
    %78 = vector.shape_cast %77 : vector<8xf32> to vector<1x8xf32>
    %79 = vector.broadcast %78 : vector<1x8xf32> to vector<64x8xf32>
    %80 = arith.addf %75, %79 : vector<64x8xf32>
    %cst_91 = arith.constant 0.000000e+00 : f32
    %81 = vector.broadcast %cst_91 : f32 to vector<64x8xf32>
    %82 = arith.maximumf %80, %81 : vector<64x8xf32>
    %83 = vector.shape_cast %82 : vector<64x8xf32> to vector<8x8x8xf32>
    %c0_92 = arith.constant 0 : index
    %c0_93 = arith.constant 0 : index
    %c0_94 = arith.constant 0 : index
    %c0_95 = arith.constant 0 : index
    %84 = vector.load %arg8[%c0_92, %c0_93, %c0_94, %c0_95] : memref<1x8x8x8xf32, #tpu.memory_space<vmem>>, vector<1x8x8x8xf32>
    %85 = vector.shape_cast %84 : vector<1x8x8x8xf32> to vector<8x8x8xf32>
    %86 = vector.shape_cast %83 : vector<8x8x8xf32> to vector<1x8x8x8xf32>
    tpu.vector_store %arg8[%c0_92, %c0_93, %c0_94, %c0_95], %86 {strides = array<i32>} : memref<1x8x8x8xf32, #tpu.memory_space<vmem>>, vector<1x8x8x8xf32>,
    return
  }
  func.func @transform_0(%arg0: i32) -> (i32, i32, i32, i32, i32) {
    %c0_i32 = arith.constant 0 : i32
    %c0_i32_0 = arith.constant 0 : i32
    %c0_i32_1 = arith.constant 0 : i32
    %c0_i32_2 = arith.constant 0 : i32
    %c0_i32_3 = arith.constant 0 : i32
    return %arg0, %c0_i32, %c0_i32_0, %c0_i32_1, %c0_i32_2 : i32, i32, i32, i32, i32
  }
  func.func @transform_1(%arg0: i32) -> (i32, i32) {
    %c0_i32 = arith.constant 0 : i32
    %c0_i32_0 = arith.constant 0 : i32
    %c0_i32_1 = arith.constant 0 : i32
    return %c0_i32, %c0_i32_0 : i32, i32
  }
  func.func @transform_2(%arg0: i32) -> (i32, i32) {
    %c0_i32 = arith.constant 0 : i32
    %c0_i32_0 = arith.constant 0 : i32
    %c0_i32_1 = arith.constant 0 : i32
    return %c0_i32, %c0_i32_0 : i32, i32
  }
  func.func @transform_3(%arg0: i32) -> (i32, i32) {
    %c0_i32 = arith.constant 0 : i32
    %c0_i32_0 = arith.constant 0 : i32
    %c0_i32_1 = arith.constant 0 : i32
    return %c0_i32, %c0_i32_0 : i32, i32
  }
  func.func @transform_4(%arg0: i32) -> (i32, i32) {
    %c0_i32 = arith.constant 0 : i32
    %c0_i32_0 = arith.constant 0 : i32
    %c0_i32_1 = arith.constant 0 : i32
    return %c0_i32, %c0_i32_0 : i32, i32
  }
  func.func @transform_5(%arg0: i32) -> (i32, i32) {
    %c0_i32 = arith.constant 0 : i32
    %c0_i32_0 = arith.constant 0 : i32
    %c0_i32_1 = arith.constant 0 : i32
    return %c0_i32, %c0_i32_0 : i32, i32
  }
  func.func @transform_6(%arg0: i32) -> (i32, i32) {
    %c0_i32 = arith.constant 0 : i32
    %c0_i32_0 = arith.constant 0 : i32
    %c0_i32_1 = arith.constant 0 : i32
    return %c0_i32, %c0_i32_0 : i32, i32
  }
  func.func @transform_7(%arg0: i32) -> (i32, i32, i32, i32) {
    %c0_i32 = arith.constant 0 : i32
    %c0_i32_0 = arith.constant 0 : i32
    %c0_i32_1 = arith.constant 0 : i32
    %c0_i32_2 = arith.constant 0 : i32
    return %arg0, %c0_i32, %c0_i32_0, %c0_i32_1 : i32, i32, i32, i32
  }
}

</mosaic_0001>

<bundles_post_ra>
// kernel: tpu_custom_call.1
= control target key start
LH: loop header
LB: loop body
LE: loop exit
PB: predicated region body
PF: predicated region fallthrough
CT: control target
= control target key end

     0   :  { %12 = vsyncpa [#allocation5], 0  ;;  %s2597_s0 = inlined_call_operand.vmem [shape: f32[2,4,8,8,4], index: 0, kind: input, shape index: {}]   ;;  %s2598_s1 = inlined_call_operand.vmem [shape: f32[36,8], index: 1, kind: input, shape index: {}]   ;;  %s2599_s2 = inlined_call_operand.vmem [shape: f32[1,8], index: 2, kind: input, shape index: {}]   ;;  %s2600_s3 = inlined_call_operand.vmem [shape: f32[1,8], index: 3, kind: input, shape index: {}]   ;;  %s2601_s4 = inlined_call_operand.vmem [shape: f32[72,8], index: 4, kind: input, shape index: {}]   ;;  %s2602_s5 = inlined_call_operand.vmem [shape: f32[1,8], index: 5, kind: input, shape index: {}]   ;;  %s2603_s6 = inlined_call_operand.vmem [shape: f32[1,8], index: 6, kind: input, shape index: {}]   ;;  %s2604_s7 = inlined_call_operand.hbm [shape: f32[2,8,8,8], index: 7, kind: output, shape index: {}]  }
   0x1   :  { %14 = vsyncpa [#allocation5 + $0x1], 0  ;;  %s1976_s24 = smov 0   ;;  %s1978_s25 = smov 0  }
   0x2   :  { %s1980_s26 = smov 0   ;;  %s1982_s27 = smov 0  }
   0x3 LB: > { %s1997_s28 = sadd.s32 4294967295, %s1919_s27   ;;  %s1638_s29 = sadd.s32 4294967294, %s1919_s27   ;;  %s1919_s27 = sphi %s1982_s27, %s2621_s27   ;;  %s1915_s26 = sphi %s1980_s26, %s2620_s26   ;;  %s1911_s25 = sphi %s1978_s25, %s2619_s25   ;;  %s1907_s24 = sphi %s1976_s24, %s2618_s24  }
   0x4   : > { %s2001_s30 = sadd.s32 1, %s1919_s27   ;;  %s179_s8 = sadd.s32 1, %s1915_s26 }
   0x5   : > { %s176_s9 = ssub.s32 %s1919_s27, %s2001_s30  ;;  %p189_p0 = scmp.ne.s32.totalorder %s1915_s26, %s1911_s25 }
   0x6   : > { %p177_p1 = scmp.eq.s32.totalorder %s176_s9, 0  ;;  %p190_p2 = scmp.eq.s32.totalorder %s1997_s28, 1 }
   0x7   : > { %p195_p3 = scmp.ne.s32.totalorder %s1911_s25, %s1907_s24  ;;  %p196_p4 = scmp.eq.s32.totalorder %s1638_s29, 1 }
   0x8   : > { %s2012_s10 = scalar_select %p177_p1, %s1915_s26, %s179_s8  }
   0x9   : > { %p2014_p5 = por %p190_p2, %p189_p0  ;;  %p2018_p6 = por %p196_p4, %p195_p3 }
   0xa   : > { %p1641_p7 = scmp.ge.s32.totalorder %s1919_s27, 1  ;;  %p240_p8 = scmp.lt.s32.totalorder %s1919_s27, 3 }
   0xc   : > { %p241_p9 = pnand %p1641_p7, %p240_p8 }
   0xd   : > { %s2605_s13 = sand.u32 (!%p241_p9), 1, %s1911_s25   ;;  %p272_p10 = scmp.lt.s32.totalorder (!%p241_p9), %s1997_s28, 1 }
   0xe   : > { %244 = sbr.rel (%p241_p9) target bundleno = 929 (0x3a1), region = 48  ;;  %s1642_s14 = sshll.u32 (!%p241_p9), %s2605_s13, 6 }
   0xf   : > { %s2034_s20 = scalar_lea.vmem (!%p241_p9), [#allocation4], %s1642_s14  ;;  %p1645_p11 = scmp.ne.s32.totalorder (!%p241_p9), %s1997_s28, 0 }
  0x15   : > { %s273_s15 = scalar_select %p272_p10, %s1997_s28, 1 }
  0x16   : > { %280 = sbr.rel (%p1645_p11) target bundleno = 43 (0x2b), region = 52  ;;  %vm281_vm0 = vcmask (!%p1645_p11), 31744   ;;  %vm283_vm1 = vcmask (!%p1645_p11), 25600   ;;  %vm303_vm2 = vcmask (!%p1645_p11), 64512   ;;  %v1921_v0 = vmov (!%p1645_p11), 0.0  }
  0x17   : > { %s1696_s16 = sshll.u32 %s273_s15, 8  ;;  %282 = vst.msk [vmem:[#allocation2] sm:$0xff] (!%p1645_p11), %vm281_vm0, %v1921_v0  ;;  %285 = vst.msk [vmem:[#allocation2 + $0x10] sm:$0xff] (!%p1645_p11), %vm281_vm0, %v1921_v0  ;;  %vm305_vm3 = vcmask (!%p1645_p11), 58368  }
  0x18   : > { %s2032_s19 = scalar_lea.vmem %s2597_s0, %s1696_s16  ;;  %287 = vst.msk [vmem:[#allocation2 + $0x20] sm:$0xff] (!%p1645_p11), %vm281_vm0, %v1921_v0  ;;  %289 = vst.msk [vmem:[#allocation2 + $0x30] sm:$0xff] (!%p1645_p11), %vm281_vm0, %v1921_v0 }
  0x19   : > { %291 = vst.msk [vmem:[#allocation2 + $0x40] sm:$0xff] (!%p1645_p11), %vm281_vm0, %v1921_v0  ;;  %293 = vst.msk [vmem:[#allocation2 + $0x50] sm:$0xff] (!%p1645_p11), %vm281_vm0, %v1921_v0 }
  0x1a   : > { %295 = vst.msk [vmem:[#allocation2 + $0x60] sm:$0xff] (!%p1645_p11), %vm281_vm0, %v1921_v0  ;;  %297 = vst.msk [vmem:[#allocation2 + $0x70] sm:$0xff] (!%p1645_p11), %vm281_vm0, %v1921_v0 }
  0x1b   : > { %299 = vst.msk [vmem:[#allocation2 + $0x80] sm:$0xff] (!%p1645_p11), %vm281_vm0, %v1921_v0  ;;  %301 = vst.msk [vmem:[#allocation2 + $0x90] sm:$0xff] (!%p1645_p11), %vm281_vm0, %v1921_v0 }
  0x1c   : > { %284 = vst.msk [vmem:[#allocation2 + $0x8] sm:$0x3] (!%p1645_p11), %vm283_vm1, %v1921_v0  ;;  %286 = vst.msk [vmem:[#allocation2 + $0x18] sm:$0x3] (!%p1645_p11), %vm283_vm1, %v1921_v0 }
  0x1d   : > { %288 = vst.msk [vmem:[#allocation2 + $0x28] sm:$0x3] %vm283_vm1, %v1921_v0  ;;  %290 = vst.msk [vmem:[#allocation2 + $0x38] sm:$0x3] %vm283_vm1, %v1921_v0 }
  0x1e   : > { %292 = vst.msk [vmem:[#allocation2 + $0x48] sm:$0x3] %vm283_vm1, %v1921_v0  ;;  %294 = vst.msk [vmem:[#allocation2 + $0x58] sm:$0x3] %vm283_vm1, %v1921_v0 }
  0x1f   : > { %296 = vst.msk [vmem:[#allocation2 + $0x68] sm:$0x3] %vm283_vm1, %v1921_v0  ;;  %298 = vst.msk [vmem:[#allocation2 + $0x78] sm:$0x3] %vm283_vm1, %v1921_v0 }
  0x20   : > { %300 = vst.msk [vmem:[#allocation2 + $0x88] sm:$0x3] %vm283_vm1, %v1921_v0  ;;  %302 = vst.msk [vmem:[#allocation2 + $0x98] sm:$0x3] %vm283_vm1, %v1921_v0 }
  0x21   : > { %304 = vst.msk [vmem:[#allocation3] sm:$0xff] %vm303_vm2, %v1921_v0  ;;  %307 = vst.msk [vmem:[#allocation3 + $0x10] sm:$0xff] %vm303_vm2, %v1921_v0 }
  0x22   : > { %309 = vst.msk [vmem:[#allocation3 + $0x20] sm:$0xff] %vm303_vm2, %v1921_v0  ;;  %311 = vst.msk [vmem:[#allocation3 + $0x30] sm:$0xff] %vm303_vm2, %v1921_v0 }
  0x23   : > { %313 = vst.msk [vmem:[#allocation3 + $0x40] sm:$0xff] %vm303_vm2, %v1921_v0  ;;  %315 = vst.msk [vmem:[#allocation3 + $0x50] sm:$0xff] %vm303_vm2, %v1921_v0 }
  0x24   : > { %317 = vst.msk [vmem:[#allocation3 + $0x60] sm:$0xff] %vm303_vm2, %v1921_v0  ;;  %319 = vst.msk [vmem:[#allocation3 + $0x70] sm:$0xff] %vm303_vm2, %v1921_v0 }
  0x25   : > { %321 = vst.msk [vmem:[#allocation3 + $0x80] sm:$0xff] %vm303_vm2, %v1921_v0  ;;  %323 = vst.msk [vmem:[#allocation3 + $0x90] sm:$0xff] %vm303_vm2, %v1921_v0 }
  0x26   : > { %306 = vst.msk [vmem:[#allocation3 + $0x8] sm:$0x3] %vm305_vm3, %v1921_v0  ;;  %308 = vst.msk [vmem:[#allocation3 + $0x18] sm:$0x3] %vm305_vm3, %v1921_v0 }
  0x27   : > { %310 = vst.msk [vmem:[#allocation3 + $0x28] sm:$0x3] %vm305_vm3, %v1921_v0  ;;  %312 = vst.msk [vmem:[#allocation3 + $0x38] sm:$0x3] %vm305_vm3, %v1921_v0 }
  0x28   : > { %314 = vst.msk [vmem:[#allocation3 + $0x48] sm:$0x3] %vm305_vm3, %v1921_v0  ;;  %316 = vst.msk [vmem:[#allocation3 + $0x58] sm:$0x3] %vm305_vm3, %v1921_v0 }
  0x29   : > { %318 = vst.msk [vmem:[#allocation3 + $0x68] sm:$0x3] %vm305_vm3, %v1921_v0  ;;  %320 = vst.msk [vmem:[#allocation3 + $0x78] sm:$0x3] %vm305_vm3, %v1921_v0 }
  0x2a   : > { %322 = vst.msk [vmem:[#allocation3 + $0x88] sm:$0x3] %vm305_vm3, %v1921_v0  ;;  %324 = vst.msk [vmem:[#allocation3 + $0x98] sm:$0x3] %vm305_vm3, %v1921_v0 }
  0x2b PF: > { %v325_v3 = vld [vmem:[%s2032_s19] sm:$0xff]  ;;  %s1922_s21 = smov 4   ;;  %s1923_s22 = smov 8   ;;  %v326_v8 = vld [vmem:[%s2032_s19 + $0x8] sm:$0xff]  ;;  %v327_v14 = vld [vmem:[%s2032_s19 + $0x10] sm:$0xff]  ;;  %vm385_vm4 = vcmask 31744  }
  0x2c   : > { %v1646_v4 = vld [vmem:[%s2032_s19 + $0x40] sm:$0xff]  ;;  %v1647_v9 = vld [vmem:[%s2032_s19 + $0x48] sm:$0xff]  ;;  %v1648_v16 = vld [vmem:[%s2032_s19 + $0x50] sm:$0xff]  ;;  %s1924_s23 = smov 12   ;;  %s1925_s29 = smov 16   ;;  %vm824_vm5 = vcmask 1043456  }
  0x2d   : > { %v1654_v5 = vld [vmem:[%s2032_s19 + $0x80] sm:$0xff]  ;;  %v342_v6 = vmax.f32 %v325_v3, %v1646_v4  ;;  %v343_v11 = vmax.f32 %v326_v8, %v1647_v9  ;;  %v1655_v12 = vld [vmem:[%s2032_s19 + $0x88] sm:$0xff]  ;;  %v1656_v17 = vld [vmem:[%s2032_s19 + $0x90] sm:$0xff]  ;;  %v344_v20 = vmax.f32 %v327_v14, %v1648_v16  ;;  %s1926_s8 = smov 20   ;;  %s1927_s17 = smov 24   ;;  %vm731_vm6 = vcmask 64512  }
  0x2e   : > { %v1662_v7 = vld [vmem:[%s2032_s19 + $0xc0] sm:$0xff]  ;;  %v1663_v13 = vld [vmem:[%s2032_s19 + $0xc8] sm:$0xff]  ;;  %v1664_v18 = vld [vmem:[%s2032_s19 + $0xd0] sm:$0xff]  ;;  %s1928_s13 = smov 28   ;;  %s1929_s18 = smov 32   ;;  %vm740_vm7 = vcmask 97280  }
  0x2f   : > { %v368_v10 = vmax.f32 %v1654_v5, %v1662_v7  ;;  %v369_v15 = vmax.f32 %v1655_v12, %v1663_v13  ;;  %v370_v21 = vmax.f32 %v1656_v17, %v1664_v18  ;;  %v328_v22 = vld [vmem:[%s2032_s19 + $0x18] sm:$0xff]  ;;  %v329_v28 = vld [vmem:[%s2032_s19 + $0x20] sm:$0xff]  ;;  %v330_v35 = vld [vmem:[%s2032_s19 + $0x28] sm:$0xff]  ;;  %vm749_vm8 = vcmask 130048   ;;  %s1932_s14 = smov 40   ;;  %s2606_s15 = smov 64  }
  0x30   : > { %v1649_v23 = vld [vmem:[%s2032_s19 + $0x58] sm:$0xff]  ;;  %v1650_v29 = vld [vmem:[%s2032_s19 + $0x60] sm:$0xff]  ;;  %v1651_v37 = vld [vmem:[%s2032_s19 + $0x68] sm:$0xff]  ;;  %vm758_vm9 = vcmask 162816   ;;  %vm767_vm10 = vcmask 195584   ;;  %vm776_vm11 = vcmask 228352  }
  0x31   : > { %v402_v1 = vld [vmem:[#allocation2 + $0x1] sm:$0xff]  ;;  %v376_v19 = vmax.f32 %v342_v6, %v368_v10  ;;  %v1657_v24 = vld [vmem:[%s2032_s19 + $0x98] sm:$0xff]  ;;  %v377_v25 = vmax.f32 %v343_v11, %v369_v15  ;;  %v345_v26 = vmax.f32 %v328_v22, %v1649_v23  ;;  %v378_v30 = vmax.f32 %v344_v20, %v370_v21  ;;  %v331_v43 = vld [vmem:[%s2032_s19 + $0x30] sm:$0xff]  ;;  %s2614_s16 = smov 48  }
  0x32   : > { %v410_v2 = vld [vmem:[#allocation2 + $0x2] sm:$0xff]  ;;  %475 = vrot.lane.b32.xlu0 %v402_v1, %s1922_s21  ;;  %v1665_v27 = vld [vmem:[%s2032_s19 + $0xd8] sm:$0xff]  ;;  %v346_v32 = vmax.f32 %v329_v28, %v1650_v29  ;;  %v347_v41 = vmax.f32 %v330_v35, %v1651_v37  ;;  %v1652_v44 = vld [vmem:[%s2032_s19 + $0x70] sm:$0xff]  ;;  %vm785_vm12 = vcmask 261120   ;;  %vm799_vm13 = vcmask 293888  }
  0x33   : > { %507 = vrot.lane.b32.xlu1 %v410_v2, %s1923_s22  ;;  %386 = vst.msk [vmem:[#allocation2 + $0x11] sm:$0xff] %vm385_vm4, %v376_v19  ;;  %v371_v31 = vmax.f32 %v1657_v24, %v1665_v27  ;;  %v1658_v33 = vld [vmem:[%s2032_s19 + $0xa0] sm:$0xff]  ;;  %387 = vst.msk [vmem:[#allocation2 + $0x21] sm:$0xff] %vm385_vm4, %v377_v25  ;;  %v1659_v38 = vld [vmem:[%s2032_s19 + $0xa8] sm:$0xff]  ;;  %v348_v47 = vmax.f32 %v331_v43, %v1652_v44  ;;  %vm1341_vm14 = vcmask 326656   ;;  %vm1350_vm15 = vcmask 392192  }
  0x34   : > { %v1666_v34 = vld [vmem:[%s2032_s19 + $0xe0] sm:$0xff]  ;;  %v1667_v39 = vld [vmem:[%s2032_s19 + $0xe8] sm:$0xff]  ;;  %388 = vst.msk [vmem:[#allocation2 + $0x31] sm:$0xff] %vm385_vm4, %v378_v30  ;;  %v1660_v45 = vld [vmem:[%s2032_s19 + $0xb0] sm:$0xff]  ;;  %vm1359_vm0 = vcmask 457728   ;;  %vm1368_vm1 = vcmask 523264  }
  0x35   : > { %v372_v36 = vmax.f32 %v1658_v33, %v1666_v34  ;;  %v379_v40 = vmax.f32 %v345_v26, %v371_v31  ;;  %v373_v42 = vmax.f32 %v1659_v38, %v1667_v39  ;;  %v1668_v48 = vld [vmem:[%s2032_s19 + $0xf0] sm:$0xff]  ;;  %v332_v49 = vld [vmem:[%s2032_s19 + $0x38] sm:$0xff]  ;;  %v794_v2 = vld [vmem:[%s2598_s1] sm:$0xff]  ;;  %vm1386_vm2 = vcmask 588800  }
  0x36   : > { %v1653_v50 = vld [vmem:[%s2032_s19 + $0x78] sm:$0xff]  ;;  %v374_v52 = vmax.f32 %v1660_v45, %v1668_v48  ;;  %v795_v3 = vld [vmem:[%s2598_s1 + $0x8] sm:$0xff]  ;;  %v796_v7 = vld [vmem:[%s2598_s1 + $0x10] sm:$0xff] }
  0x37   : > { %v380_v46 = vmax.f32 %v346_v32, %v372_v36  ;;  %389 = vst.msk [vmem:[#allocation2 + $0x41] sm:$0xff] %vm385_vm4, %v379_v40  ;;  %v381_v51 = vmax.f32 %v347_v41, %v373_v42  ;;  %v349_v53 = vmax.f32 %v332_v49, %v1653_v50  ;;  %v1661_v54 = vld [vmem:[%s2032_s19 + $0xb8] sm:$0xff]  ;;  %v1780_v4 = vpack.c.bf16 %v795_v3, %v794_v2  ;;  %v798_v10 = vld [vmem:[%s2598_s1 + $0x20] sm:$0xf]  ;;  %v450_v28 = vld [vmem:[#allocation2 + $0x90] sm:$0xff] }
  0x38   : > { %v1669_v55 = vld [vmem:[%s2032_s19 + $0xf8] sm:$0xff]  ;;  %v382_v57 = vmax.f32 %v348_v47, %v374_v52  ;;  %v394_v45 = vld [vmem:[#allocation2] sm:$0xff]  ;;  %s1576_s19 = sshll.u32 %s2034_s20, 4  ;;  %s2547_s19 = int_to_ptr.vmem [resolvable:$true] %s1576_s19 }
  0x39   : > { %390 = vst.msk [vmem:[#allocation2 + $0x51] sm:$0xff] %vm385_vm4, %v380_v46  ;;  %v375_v56 = vmax.f32 %v1661_v54, %v1669_v55  ;;  %391 = vst.msk [vmem:[#allocation2 + $0x61] sm:$0xff] %vm385_vm4, %v381_v51  ;;  %1781 = vmatprep.subr.bf16.mxu0 %v1780_v4  ;;  %v797_v8 = vld [vmem:[%s2598_s1 + $0x18] sm:$0xff] }
  0x3a   : > { %v411_v58 = vld [vmem:[#allocation2 + $0x12] sm:$0xff]  ;;  %392 = vst.msk [vmem:[#allocation2 + $0x71] sm:$0xff] %vm385_vm4, %v382_v57  ;;  %v2100_v61 = vld [vmem:[#allocation2 + $0x20] sm:$0xff]  ;;  %1783 = vmatpush3.bf16.msra.mxu0 %v1780_v4  ;;  %v1784_v9 = vpack.c.bf16 %v797_v8, %v796_v7 }
  0x3b   : > { %v403_v59 = vld [vmem:[#allocation2 + $0x11] sm:$0xff]  ;;  %v383_v60 = vmax.f32 %v349_v53, %v375_v56  ;;  %509 = vrot.lane.b32.xlu1 %v411_v58, %s1923_s22  ;;  %v404_v63 = vld [vmem:[#allocation2 + $0x21] sm:$0xff] }
  0x3c   : > { %477 = vrot.lane.b32.xlu0 %v403_v59, %s1922_s21  ;;  %v2102_v62 = vld [vmem:[#allocation2 + $0x10] sm:$0xff]  ;;  %v412_v0 = vld [vmem:[#allocation2 + $0x22] sm:$0xff]  ;;  %1785 = vmatprep.subr.bf16.mxu0 %v1784_v9 }
  0x3d   : > { %393 = vst.msk [vmem:[#allocation2 + $0x81] sm:$0xff] %vm385_vm4, %v383_v60  ;;  %v405_v1 = vld [vmem:[#allocation2 + $0x31] sm:$0xff] }
  0x3e   : > { %v2124_v5 = vld [vmem:[#allocation2 + $0x30] sm:$0xff]  ;;  %1787 = vmatpush3.bf16.msra.mxu0 %v1784_v9  ;;  %v2141_v11 = vld [vmem:[#allocation2 + $0x40] sm:$0xff] }
  0x3f   : > { %541 = vrot.lane.b32.xlu1 %v2100_v61, %s1924_s23  ;;  %v413_v6 = vld [vmem:[#allocation2 + $0x32] sm:$0xff]  ;;  %1736 = vmatprep.subr.msk.mxu0 %vm824_vm5, %v798_v10  ;;  %v429_v12 = vld [vmem:[#allocation2 + $0x41] sm:$0xff] }
  0x40   : > { %539 = vrot.lane.b32.xlu0 %v2102_v62, %s1924_s23  ;;  %v414_v13 = vld [vmem:[#allocation2 + $0x42] sm:$0xff]  ;;  %v407_v14 = vld [vmem:[#allocation2 + $0x51] sm:$0xff] }
  0x41   : > { %v2157_v15 = vld [vmem:[#allocation2 + $0x50] sm:$0xff]  ;;  %v2165_v17 = vld [vmem:[#allocation2 + $0x60] sm:$0xff] }
  0x42   : > { %1737 = vmatpush3.msk.msra.mxu0 %vm824_vm5, %v798_v10  ;;  %v415_v16 = vld [vmem:[#allocation2 + $0x52] sm:$0xff]  ;;  %v431_v18 = vld [vmem:[#allocation2 + $0x61] sm:$0xff] }
  0x43   : > { %479 = vrot.lane.b32.xlu1 %v404_v63, %s1922_s21  ;;  %v416_v19 = vld [vmem:[#allocation2 + $0x62] sm:$0xff]  ;;  %v409_v20 = vld [vmem:[#allocation2 + $0x71] sm:$0xff] }
  0x44   : > { %571 = vrot.lane.b32.xlu0 %v403_v59, %s1925_s29  ;;  %v2181_v21 = vld [vmem:[#allocation2 + $0x70] sm:$0xff]  ;;  %v425_v23 = vld [vmem:[#allocation2 + $0x80] sm:$0xff] }
  0x45   : > { %v417_v22 = vld [vmem:[#allocation2 + $0x72] sm:$0xff]  ;;  %v433_v24 = vld [vmem:[#allocation2 + $0x81] sm:$0xff] }
  0x46   : > { %v441_v25 = vld [vmem:[#allocation2 + $0x82] sm:$0xff]  ;;  %v458_v29 = vld [vmem:[#allocation2 + $0x91] sm:$0xff] }
  0x47   : > { %603 = vrot.lane.b32.xlu1 %v411_v58, %s1926_s8  ;;  %v466_v32 = vld [vmem:[#allocation2 + $0x92] sm:$0xff] }
  0x48   : > { %573 = vrot.lane.b32.xlu0 %v404_v63, %s1925_s29 }
  0x4b   : > { %511 = vrot.lane.b32.xlu1 %v412_v0, %s1923_s22 }
  0x4c   : > { %481 = vrot.lane.b32.xlu0 %v405_v1, %s1922_s21 }
  0x4f   : > { %635 = vrot.lane.b32.xlu1 %v2100_v61, %s1927_s17 }
  0x50   : > { %605 = vrot.lane.b32.xlu0 %v412_v0, %s1926_s8 }
  0x53   : > { %543 = vrot.lane.b32.xlu1 %v2124_v5, %s1924_s23 }
  0x54   : > { %513 = vrot.lane.b32.xlu0 %v413_v6, %s1923_s22 }
  0x57   : > { %667 = vrot.lane.b32.xlu1 %v404_v63, %s1928_s13 }
  0x58   : > { %637 = vrot.lane.b32.xlu0 %v2124_v5, %s1927_s17 }
  0x5b   : > { %575 = vrot.lane.b32.xlu1 %v405_v1, %s1925_s29 }
  0x5c   : > { %545 = vrot.lane.b32.xlu0 %v2141_v11, %s1924_s23 }
  0x5f   : > { %699 = vrot.lane.b32.xlu1 %v412_v0, %s1929_s18 }
  0x60   : > { %669 = vrot.lane.b32.xlu0 %v405_v1, %s1928_s13 }
  0x63   : > { %577 = vrot.lane.b32.xlu1 %v429_v12, %s1925_s29 }
  0x64   : > { %483 = vrot.lane.b32.xlu0 %v429_v12, %s1922_s21 }
  0x67   : > { %701 = vrot.lane.b32.xlu1 %v413_v6, %s1929_s18 }
  0x68   : > { %607 = vrot.lane.b32.xlu0 %v413_v6, %s1926_s8 }
  0x6b   : > { %515 = vrot.lane.b32.xlu1 %v414_v13, %s1923_s22 }
  0x6c   : > { %485 = vrot.lane.b32.xlu0 %v407_v14, %s1922_s21 }
  0x6f   : > { %639 = vrot.lane.b32.xlu1 %v2141_v11, %s1927_s17 }
  0x70   : > { %609 = vrot.lane.b32.xlu0 %v414_v13, %s1926_s8 }
  0x73   : > { %547 = vrot.lane.b32.xlu1 %v2157_v15, %s1924_s23 }
  0x74   : > { %517 = vrot.lane.b32.xlu0 %v415_v16, %s1923_s22 }
  0x77   : > { %671 = vrot.lane.b32.xlu1 %v429_v12, %s1928_s13 }
  0x78   : > { %641 = vrot.lane.b32.xlu0 %v2157_v15, %s1927_s17 }
  0x7b   : > { %579 = vrot.lane.b32.xlu1 %v407_v14, %s1925_s29 }
  0x7c   : > { %549 = vrot.lane.b32.xlu0 %v2165_v17, %s1924_s23 }
  0x7f   : > { %703 = vrot.lane.b32.xlu1 %v414_v13, %s1929_s18 }
  0x80   : > { %673 = vrot.lane.b32.xlu0 %v407_v14, %s1928_s13 }
  0x83   : > { %581 = vrot.lane.b32.xlu1 %v431_v18, %s1925_s29 }
  0x84   : > { %487 = vrot.lane.b32.xlu0 %v431_v18, %s1922_s21 }
  0x87   : > { %705 = vrot.lane.b32.xlu1 %v415_v16, %s1929_s18 }
  0x88   : > { %611 = vrot.lane.b32.xlu0 %v415_v16, %s1926_s8 }
  0x8b   : > { %519 = vrot.lane.b32.xlu1 %v416_v19, %s1923_s22 }
  0x8c   : > { %489 = vrot.lane.b32.xlu0 %v409_v20, %s1922_s21  ;;  %s2608_s21 = smov 56  }
  0x8f   : > { %643 = vrot.lane.b32.xlu1 %v2165_v17, %s1927_s17 }
  0x90   : > { %613 = vrot.lane.b32.xlu0 %v416_v19, %s1926_s8 }
  0x93   : > { %551 = vrot.lane.b32.xlu1 %v2181_v21, %s1924_s23 }
  0x94   : > { %521 = vrot.lane.b32.xlu0 %v417_v22, %s1923_s22 }
  0x97   : > { %675 = vrot.lane.b32.xlu1 %v431_v18, %s1928_s13 }
  0x98   : > { %645 = vrot.lane.b32.xlu0 %v2181_v21, %s1927_s17 }
  0x9b   : > { %583 = vrot.lane.b32.xlu1 %v409_v20, %s1925_s29 }
  0x9c   : > { %553 = vrot.lane.b32.xlu0 %v425_v23, %s1924_s23  ;;  %s2615_s23 = smov 56  }
  0x9f   : > { %707 = vrot.lane.b32.xlu1 %v416_v19, %s1929_s18 }
  0xa0   : > { %677 = vrot.lane.b32.xlu0 %v409_v20, %s1928_s13 }
  0xa3   : > { %615 = vrot.lane.b32.xlu1 %v417_v22, %s1926_s8 }
  0xa4   : > { %585 = vrot.lane.b32.xlu0 %v433_v24, %s1925_s29  ;;  %v476_v26 = vpop.permute.xlu0 %475 }
  0xa5   : > { %v508_v27 = vpop.permute.xlu1 %507  ;;  %v723_v46 = vsel %vm385_vm4, %v394_v45, %v476_v26 }
  0xa6   : > { %v732_v49 = vsel %vm731_vm6, %v723_v46, %v508_v27 }
  0xa7   : > { %617 = vrot.lane.b32.xlu1 %v441_v25, %s1926_s8 }
  0xa8   : > { %709 = vrot.lane.b32.xlu0 %v417_v22, %s1929_s18 }
  0xab   : > { %649 = vrot.lane.b32.xlu1 %v450_v28, %s1927_s17 }
  0xac   : > { %647 = vrot.lane.b32.xlu0 %v425_v23, %s1927_s17 }
  0xad   : > { %v510_v30 = vpop.permute.xlu1 %509 }
  0xae   : > { %v478_v31 = vpop.permute.xlu0 %477 }
  0xaf   : > { %681 = vrot.lane.b32.xlu1 %v458_v29, %s1928_s13  ;;  %v724_v56 = vsel %vm385_vm4, %v2102_v62, %v478_v31 }
  0xb0   : > { %679 = vrot.lane.b32.xlu0 %v433_v24, %s1928_s13  ;;  %v733_v63 = vsel %vm731_vm6, %v724_v56, %v510_v30  ;;  %s2610_s13 = smov 48  }
  0xb1   : > { %v542_v33 = vpop.permute.xlu1 %541 }
  0xb2   : > { %v540_v34 = vpop.permute.xlu0 %539  ;;  %v742_v0 = vsel %vm740_vm7, %v733_v63, %v542_v33 }
  0xb3   : > { %713 = vrot.lane.b32.xlu1 %v466_v32, %s1929_s18  ;;  %v741_v50 = vsel %vm740_vm7, %v732_v49, %v540_v34 }
  0xb4   : > { %711 = vrot.lane.b32.xlu0 %v441_v25, %s1929_s18 }
  0xb5   : > { %v480_v35 = vpop.permute.xlu1 %479 }
  0xb6   : > { %v572_v36 = vpop.permute.xlu0 %571  ;;  %v725_v22 = vsel %vm385_vm4, %v2100_v61, %v480_v35 }
  0xb7   : > { %v750_v53 = vsel %vm749_vm8, %v741_v50, %v572_v36 }
  0xb9   : > { %v604_v37 = vpop.permute.xlu1 %603 }
  0xba   : > { %v574_v38 = vpop.permute.xlu0 %573  ;;  %v759_v54 = vsel %vm758_vm9, %v750_v53, %v604_v37 }
  0xbb   : > { %v751_v3 = vsel %vm749_vm8, %v742_v0, %v574_v38 }
  0xbd   : > { %v512_v39 = vpop.permute.xlu1 %511 }
  0xbe   : > { %v2203_v40 = vpop.permute.xlu0 %481  ;;  %v734_v23 = vsel %vm731_vm6, %v725_v22, %v512_v39 }
  0xbf   : > { %v726_v61 = vsel %vm385_vm4, %v2124_v5, %v2203_v40 }
  0xc1   : > { %v636_v41 = vpop.permute.xlu1 %635 }
  0xc2   : > { %v606_v42 = vpop.permute.xlu0 %605  ;;  %v768_v55 = vsel %vm767_vm10, %v759_v54, %v636_v41 }
  0xc3   : > { %v760_v4 = vsel %vm758_vm9, %v751_v3, %v606_v42 }
  0xc5   : > { %v544_v43 = vpop.permute.xlu1 %543 }
  0xc6   : > { %v514_v44 = vpop.permute.xlu0 %513  ;;  %v743_v24 = vsel %vm740_vm7, %v734_v23, %v544_v43 }
  0xc7   : > { %v735_v34 = vsel %vm731_vm6, %v726_v61, %v514_v44 }
  0xc9   : > { %v668_v47 = vpop.permute.xlu1 %667 }
  0xca   : > { %v638_v48 = vpop.permute.xlu0 %637  ;;  %v777_v57 = vsel %vm776_vm11, %v768_v55, %v668_v47 }
  0xcb   : > { %v769_v62 = vsel %vm767_vm10, %v760_v4, %v638_v48 }
  0xcd   : > { %v576_v51 = vpop.permute.xlu1 %575 }
  0xce   : > { %v546_v52 = vpop.permute.xlu0 %545  ;;  %v752_v27 = vsel %vm749_vm8, %v743_v24, %v576_v51 }
  0xcf   : > { %v744_v35 = vsel %vm740_vm7, %v735_v34, %v546_v52 }
  0xd1   : > { %v700_v58 = vpop.permute.xlu1 %699 }
  0xd2   : > { %v670_v59 = vpop.permute.xlu0 %669  ;;  %v786_v60 = vsel %vm785_vm12, %v777_v57, %v700_v58 }
  0xd3   : > { %1738 = vmatprep.mubr.msk.f32.mxu0 %vm799_vm13, %v786_v60  ;;  %v778_v6 = vsel %vm776_vm11, %v769_v62, %v670_v59 }
  0xd5   : > { %v578_v1 = vpop.permute.xlu1 %577 }
  0xd6   : > { %v484_v2 = vpop.permute.xlu0 %483  ;;  %v753_v38 = vsel %vm749_vm8, %v744_v35, %v578_v1  ;;  %v1036_v35 = vld [vmem:[#allocation3 + $0x90] sm:$0xff] }
  0xd7   : > { %v727_v52 = vsel %vm385_vm4, %v2141_v11, %v484_v2  ;;  %1235 = vrot.lane.b32.xlu1 %v1036_v35, %s2610_s13 }
  0xd9   : > { %v702_v7 = vpop.permute.xlu1 %701 }
  0xda   : > { %v608_v8 = vpop.permute.xlu0 %607  ;;  %v787_v9 = vsel %vm785_vm12, %v778_v6, %v702_v7 }
  0xdb   : > { %1739 = vmatmul.mubr.msk.f32.vlgmr.msra.gmra.mrb[0].mxu0 %vm799_vm13, %v787_v9  ;;  %v761_v28 = vsel %vm758_vm9, %v752_v27, %v608_v8 }
  0xdd   : > { %v516_v10 = vpop.permute.xlu1 %515 }
  0xde   : > { %v486_v12 = vpop.permute.xlu0 %485  ;;  %v736_v53 = vsel %vm731_vm6, %v727_v52, %v516_v10 }
  0xdf   : > { %v728_v11 = vsel %vm385_vm4, %v2157_v15, %v486_v12 }
  0xe1   : > { %v640_v13 = vpop.permute.xlu1 %639 }
  0xe2   : > { %v610_v14 = vpop.permute.xlu0 %609  ;;  %v770_v29 = vsel %vm767_vm10, %v761_v28, %v640_v13 }
  0xe3   : > { %v762_v39 = vsel %vm758_vm9, %v753_v38, %v610_v14  ;;  %v996_v38 = vld [vmem:[#allocation3 + $0x2] sm:$0xff] }
  0xe5   : > { %v548_v16 = vpop.permute.xlu1 %547 }
  0xe6   : > { %v518_v18 = vpop.permute.xlu0 %517  ;;  %v745_v54 = vsel %vm740_vm7, %v736_v53, %v548_v16 }
  0xe7   : > { %v737_v2 = vsel %vm731_vm6, %v728_v11, %v518_v18  ;;  %v1378_v11 = vld [vmem:[%s2601_s4 + $0x8] sm:$0xff] }
  0xe9   : > { %v672_v19 = vpop.permute.xlu1 %671 }
  0xea   : > { %v642_v20 = vpop.permute.xlu0 %641  ;;  %v779_v30 = vsel %vm776_vm11, %v770_v29, %v672_v19 }
  0xeb   : > { %v771_v41 = vsel %vm767_vm10, %v762_v39, %v642_v20  ;;  %v2292_v39 = vld [vmem:[%s2599_s2] ss:$0 sm:$0xff] }
  0xed   : > { %v580_v25 = vpop.permute.xlu1 %579 }
  0xee   : > { %v550_v26 = vpop.permute.xlu0 %549  ;;  %v754_v57 = vsel %vm749_vm8, %v745_v54, %v580_v25 }
  0xef   : > { %v746_v3 = vsel %vm740_vm7, %v737_v2, %v550_v26 }
  0xf1   : > { %v704_v31 = vpop.permute.xlu1 %703 }
  0xf2   : > { %v674_v32 = vpop.permute.xlu0 %673  ;;  %v788_v33 = vsel %vm785_vm12, %v779_v30, %v704_v31 }
  0xf3   : > { %1741 = vmatprep.mubr.msk.f32.mxu0 %vm799_vm13, %v788_v33  ;;  %v780_v42 = vsel %vm776_vm11, %v771_v41, %v674_v32 }
  0xf5   : > { %v582_v36 = vpop.permute.xlu1 %581 }
  0xf6   : > { %v488_v37 = vpop.permute.xlu0 %487  ;;  %v755_v6 = vsel %vm749_vm8, %v746_v3, %v582_v36  ;;  %v988_v36 = vld [vmem:[#allocation3 + $0x1] sm:$0xff] }
  0xf7   : > { %v729_v16 = vsel %vm385_vm4, %v2165_v17, %v488_v37  ;;  %1061 = vrot.lane.b32.xlu0 %v988_v36, %s1923_s22  ;;  %v1044_v37 = vld [vmem:[#allocation3 + $0x91] sm:$0xff] }
  0xf8   : > { %1267 = vrot.lane.b32.xlu1 %v1044_v37, %s2608_s21 }
  0xf9   : > { %v706_v43 = vpop.permute.xlu1 %705 }
  0xfa   : > { %v612_v45 = vpop.permute.xlu0 %611  ;;  %v789_v5 = vsel %vm785_vm12, %v780_v42, %v706_v43  ;;  %v2297_v42 = vld [vmem:[%s2600_s3] ss:$0 sm:$0xff] }
  0xfb   : > { %1742 = vmatmul.mubr.msk.f32.gmra.mrb[2].mxu0 %vm799_vm13, %v789_v5  ;;  %v763_v58 = vsel %vm758_vm9, %v754_v57, %v612_v45  ;;  %1093 = vrot.lane.b32.xlu0 %v996_v38, %s1925_s29 }
  0xfd   : > { %v520_v40 = vpop.permute.xlu1 %519 }
  0xfe   : > { %v490_v44 = vpop.permute.xlu0 %489  ;;  %v738_v19 = vsel %vm731_vm6, %v729_v16, %v520_v40 }
  0xff   : > { %v730_v18 = vsel %vm385_vm4, %v2181_v21, %v490_v44 }
 0x101   : > { %v644_v46 = vpop.permute.xlu1 %643 }
 0x102   : > { %v614_v47 = vpop.permute.xlu0 %613  ;;  %v772_v59 = vsel %vm767_vm10, %v763_v58, %v644_v46 }
 0x103   : > { %v764_v7 = vsel %vm758_vm9, %v755_v6, %v614_v47 }
 0x105   : > { %v552_v48 = vpop.permute.xlu1 %551 }
 0x106   : > { %v522_v49 = vpop.permute.xlu0 %521  ;;  %v747_v22 = vsel %vm740_vm7, %v738_v19, %v552_v48  ;;  %v1385_v19 = vld [vmem:[%s2601_s4 + $0x40] sm:$0xff] }
 0x107   : > { %v739_v20 = vsel %vm731_vm6, %v730_v18, %v522_v49 }
 0x109   : > { %v676_v50 = vpop.permute.xlu1 %675 }
 0x10a   : > { %v646_v51 = vpop.permute.xlu0 %645  ;;  %v781_v60 = vsel %vm776_vm11, %v772_v59, %v676_v50 }
 0x10b   : > { %v773_v8 = vsel %vm767_vm10, %v764_v7, %v646_v51 }
 0x10d   : > { %v584_v55 = vpop.permute.xlu1 %583 }
 0x10e   : > { %v554_v56 = vpop.permute.xlu0 %553  ;;  %v756_v26 = vsel %vm749_vm8, %v747_v22, %v584_v55 }
 0x10f   : > { %v748_v23 = vsel %vm740_vm7, %v739_v20, %v554_v56 }
 0x111   : > { %v708_v63 = vpop.permute.xlu1 %707 }
 0x112   : > { %v678_v0 = vpop.permute.xlu0 %677  ;;  %v790_v1 = vsel %vm785_vm12, %v781_v60, %v708_v63 }
 0x113   : > { %1744 = vmatprep.mubr.msk.f32.mxu0 %vm799_vm13, %v790_v1  ;;  %v782_v9 = vsel %vm776_vm11, %v773_v8, %v678_v0  ;;  %v1377_v1 = vld [vmem:[%s2601_s4] sm:$0xff] }
 0x114   : > { %v1788_v2 = vpack.c.bf16 %v1378_v11, %v1377_v1  ;;  %v1381_v8 = vld [vmem:[%s2601_s4 + $0x20] sm:$0xff] }
 0x115   : > { %v616_v4 = vpop.permute.xlu1 %615 }
 0x116   : > { %v586_v62 = vpop.permute.xlu0 %585  ;;  %v765_v28 = vsel %vm758_vm9, %v756_v26, %v616_v4  ;;  %v1379_v4 = vld [vmem:[%s2601_s4 + $0x10] sm:$0xff]  ;;  %1789 = vmatprep.subr.bf16.mxu1 %v1788_v2 }
 0x117   : > { %v757_v27 = vsel %vm749_vm8, %v748_v23, %v586_v62  ;;  %v1380_v62 = vld [vmem:[%s2601_s4 + $0x18] sm:$0xff]  ;;  %1791 = vmatpush3.bf16.msra.mxu1 %v1788_v2 }
 0x118   : > { %v1792_v6 = vpack.c.bf16 %v1380_v62, %v1379_v4 }
 0x119   : > { %v618_v10 = vpop.permute.xlu1 %617 }
 0x11a   : > { %v710_v13 = vpop.permute.xlu0 %709  ;;  %v766_v17 = vsel %vm758_vm9, %v757_v27, %v618_v10  ;;  %1793 = vmatprep.subr.bf16.mxu1 %v1792_v6 }
 0x11b   : > { %v791_v15 = vsel %vm785_vm12, %v782_v9, %v710_v13  ;;  %v1382_v9 = vld [vmem:[%s2601_s4 + $0x28] sm:$0xff]  ;;  %1795 = vmatpush3.bf16.msra.mxu1 %v1792_v6 }
 0x11c   : > { %1745 = vmatmul.mubr.msk.f32.gmra.mrb[4].mxu0 %vm799_vm13, %v791_v15  ;;  %v1796_v10 = vpack.c.bf16 %v1382_v9, %v1381_v8  ;;  %v1383_v15 = vld [vmem:[%s2601_s4 + $0x30] sm:$0xff] }
 0x11d   : > { %v650_v12 = vpop.permute.xlu1 %649 }
 0x11e   : > { %v648_v14 = vpop.permute.xlu0 %647  ;;  %v775_v21 = vsel %vm767_vm10, %v766_v17, %v650_v12  ;;  %1797 = vmatprep.subr.bf16.mxu1 %v1796_v10  ;;  %v1384_v12 = vld [vmem:[%s2601_s4 + $0x38] sm:$0xff] }
 0x11f   : > { %v774_v29 = vsel %vm767_vm10, %v765_v28, %v648_v14  ;;  %v1800_v14 = vpack.c.bf16 %v1384_v12, %v1383_v15  ;;  %1799 = vmatpush3.bf16.msra.mxu1 %v1796_v10 }
 0x121   : > { %v682_v24 = vpop.permute.xlu1 %681  ;;  %1801 = vmatprep.subr.bf16.mxu1 %v1800_v14 }
 0x122   : > { %v680_v25 = vpop.permute.xlu0 %679  ;;  %v784_v30 = vsel %vm776_vm11, %v775_v21, %v682_v24 }
 0x123   : > { %v783_v31 = vsel %vm776_vm11, %v774_v29, %v680_v25  ;;  %1803 = vmatpush3.bf16.msra.mxu1 %v1800_v14 }
 0x124   : > { %1766 = vmatprep.subr.mxu1 %v1385_v19 }
 0x125   : > { %v714_v32 = vpop.permute.xlu1 %713 }
 0x126   : > { %v712_v33 = vpop.permute.xlu0 %711  ;;  %v793_v61 = vsel %vm785_vm12, %v784_v30, %v714_v32 }
 0x127   : > { %v792_v34 = vsel %vm785_vm12, %v783_v31, %v712_v33  ;;  %1767 = vmatpush3.msra.mxu1 %v1385_v19 }
 0x128   : > { %1747 = vmatprep.mubr.msk.f32.mxu0 %vm799_vm13, %v792_v34 }
 0x129   : > { %1748 = vmatmul.mubr.msk.f32.gmra.mrb[6].mxu0 %vm799_vm13, %v793_v61 }
 0x1ae   : > { %v1740_v41 = vpop.f32.mrb[0].mxu0 }
 0x1af   : > { %v941_v43 = vmul.f32 %v1740_v41, %v2292_v39  ;;  %v894_v45 = vpop.f32.mrb[1].mxu0 }
 0x1b0   : > { %v940_v5 = vmul.f32 %v2292_v39, %v894_v45  ;;  %v2421_v45 = vpop.permute.xlu1 %1235 }
 0x1b1   : > { %v956_v40 = vadd.f32 %v2297_v42, %v941_v43 }
 0x1b2   : > { %v955_v44 = vadd.f32 %v2297_v42, %v940_v5 }
 0x1b3   : > { %v964_v46 = vmax.f32 %v956_v40, 0.0 }
 0x1b4   : > { %v963_v47 = vmax.f32 %v955_v44, 0.0  ;;  %v2430_v44 = vpop.permute.xlu1 %1267 }
 0x1b5   : > { %973 = vst.msk [vmem:[#allocation3 + $0x21] sm:$0xff] %vm731_vm6, %v964_v46 }
 0x1b6   : > { %972 = vst.msk [vmem:[#allocation3 + $0x11] sm:$0xff] %vm731_vm6, %v963_v47  ;;  %v1062_v47 = vpop.permute.xlu0 %1061 }
 0x1bc   : > { %v1013_v48 = vld [vmem:[#allocation3 + $0x21] sm:$0xff] }
 0x1bd   : > { %v2305_v49 = vld [vmem:[#allocation3 + $0x20] sm:$0xff]  ;;  %1159 = vrot.lane.b32.xlu0 %v1013_v48, %s1929_s18  ;;  %v2312_v51 = vld [vmem:[#allocation3 + $0x10] sm:$0xff] }
 0x1be   : > { %1127 = vrot.lane.b32.xlu1 %v2305_v49, %s1927_s17  ;;  %v1021_v50 = vld [vmem:[#allocation3 + $0x22] sm:$0xff]  ;;  %v1012_v52 = vld [vmem:[#allocation3 + $0x11] sm:$0xff] }
 0x1bf   : > { %v997_v63 = vld [vmem:[#allocation3 + $0x12] sm:$0xff] }
 0x1c1   : > { %1191 = vrot.lane.b32.xlu0 %v1021_v50, %s1932_s14 }
 0x1c2   : > { %1065 = vrot.lane.b32.xlu1 %v1013_v48, %s1923_s22 }
 0x1c5   : > { %1125 = vrot.lane.b32.xlu0 %v2312_v51, %s1927_s17 }
 0x1c6   : > { %1097 = vrot.lane.b32.xlu1 %v1021_v50, %s1925_s29 }
 0x1c9   : > { %1157 = vrot.lane.b32.xlu0 %v1012_v52, %s1929_s18 }
 0x1ca   : > { %1221 = vrot.lane.b32.xlu1 %v2305_v49, %s2610_s13  ;;  %s2616_s13 = smov 64  }
 0x1ce   : > { %1253 = vrot.lane.b32.xlu1 %v1013_v48, %s2608_s21  ;;  %v1743_v53 = vpop.f32.mrb[2].mxu0  ;;  %v1052_v48 = vld [vmem:[#allocation3 + $0x92] sm:$0xff]  ;;  %s1697_s21 = sshll.u32 %s1997_s28, 10  ;;  %s2617_s28 = sand.u32 1, %s1911_s25  }
 0x1cf   : > { %v943_v54 = vmul.f32 %v1743_v53, %v2292_v39  ;;  %v904_v55 = vpop.f32.mrb[3].mxu0  ;;  %s2555_s8 = scalar_lea.sflag [#allocation5], %s2617_s28 }
 0x1d0   : > { %v942_v56 = vmul.f32 %v2292_v39, %v904_v55 }
 0x1d1   : > { %v958_v57 = vadd.f32 %v2297_v42, %v943_v54 }
 0x1d2   : > { %1285 = vrot.lane.b32.xlu1 %v1021_v50, %s2606_s15  ;;  %v957_v58 = vadd.f32 %v2297_v42, %v942_v56  ;;  %s1857_s15 = scalar_lea.vmem %s2547_s19, 1024 }
 0x1d3   : > { %v966_v59 = vmax.f32 %v958_v57, 0.0  ;;  %p1858_p12 = scmp.ne.s32.totalorder %s2547_s19, %s1857_s15 }
 0x1d4   : > { %v965_v60 = vmax.f32 %v957_v58, 0.0 }
 0x1d5   : > { %975 = vst.msk [vmem:[#allocation3 + $0x41] sm:$0xff] %vm731_vm6, %v966_v59  ;;  %p1859_p13 = pnand %p1858_p12, %p2014_p5 }
 0x1d6   : > { %1063 = vrot.lane.b32.xlu1 %v1012_v52, %s1923_s22  ;;  %974 = vst.msk [vmem:[#allocation3 + $0x31] sm:$0xff] %vm731_vm6, %v965_v60  ;;  %v1094_v52 = vpop.permute.xlu0 %1093  ;;  %v980_v60 = vld [vmem:[#allocation3] sm:$0xff] }
 0x1d7   : > { %v1309_v11 = vsel %vm731_vm6, %v980_v60, %v1062_v47  ;;  %p1860_p0 = pneg %p1859_p13 }
 0x1d8   : > { %v1317_v2 = vsel %vm749_vm8, %v1309_v11, %v1094_v52 }
 0x1da   : > { %1095 = vrot.lane.b32.xlu1 %v997_v63, %s1925_s29 }
 0x1dc   : > { %v2330_v0 = vld [vmem:[#allocation3 + $0x40] sm:$0xff] }
 0x1dd   : > { %1131 = vrot.lane.b32.xlu0 %v2330_v0, %s1927_s17  ;;  %v1015_v3 = vld [vmem:[#allocation3 + $0x41] sm:$0xff]  ;;  %v991_v13 = vld [vmem:[#allocation3 + $0x31] sm:$0xff] }
 0x1de   : > { %1189 = vrot.lane.b32.xlu1 %v997_v63, %s1932_s14  ;;  %v1000_v7 = vld [vmem:[#allocation3 + $0x42] sm:$0xff]  ;;  %v999_v16 = vld [vmem:[#allocation3 + $0x32] sm:$0xff] }
 0x1df   : > { %v2373_v24 = vld [vmem:[#allocation3 + $0x30] sm:$0xff] }
 0x1e1   : > { %1069 = vrot.lane.b32.xlu0 %v1015_v3, %s1923_s22 }
 0x1e2   : > { %1163 = vrot.lane.b32.xlu1 %v1015_v3, %s1929_s18 }
 0x1e5   : > { %1195 = vrot.lane.b32.xlu0 %v1000_v7, %s1932_s14 }
 0x1e6   : > { %1101 = vrot.lane.b32.xlu1 %v1000_v7, %s1925_s29 }
 0x1e9   : > { %1067 = vrot.lane.b32.xlu0 %v991_v13, %s1923_s22 }
 0x1ea   : > { %1225 = vrot.lane.b32.xlu1 %v2330_v0, %s2614_s16 }
 0x1ed   : > { %1099 = vrot.lane.b32.xlu0 %v999_v16, %s1925_s29 }
 0x1ee   : > { %1257 = vrot.lane.b32.xlu1 %v1015_v3, %s2615_s23 }
 0x1ef   : > { %v1746_v18 = vpop.f32.mrb[4].mxu0 }
 0x1f0   : > { %v945_v20 = vmul.f32 %v1746_v18, %v2292_v39  ;;  %v914_v22 = vpop.f32.mrb[5].mxu0 }
 0x1f1   : > { %v944_v23 = vmul.f32 %v2292_v39, %v914_v22  ;;  %1223 = vrot.lane.b32.xlu0 %v2373_v24, %s2614_s16 }
 0x1f2   : > { %v960_v25 = vadd.f32 %v2297_v42, %v945_v20  ;;  %1289 = vrot.lane.b32.xlu1 %v1000_v7, %s2616_s13 }
 0x1f3   : > { %v959_v26 = vadd.f32 %v2297_v42, %v944_v23 }
 0x1f4   : > { %v968_v27 = vmax.f32 %v960_v25, 0.0 }
 0x1f5   : > { %v967_v28 = vmax.f32 %v959_v26, 0.0  ;;  %1255 = vrot.lane.b32.xlu0 %v991_v13, %s2615_s23 }
 0x1f6   : > { %977 = vst.msk [vmem:[#allocation3 + $0x61] sm:$0xff] %vm731_vm6, %v968_v27  ;;  %1129 = vrot.lane.b32.xlu1 %v2373_v24, %s1927_s17 }
 0x1f7   : > { %976 = vst.msk [vmem:[#allocation3 + $0x51] sm:$0xff] %vm731_vm6, %v967_v28 }
 0x1f9   : > { %1193 = vrot.lane.b32.xlu0 %v999_v16, %s1932_s14 }
 0x1fa   : > { %1161 = vrot.lane.b32.xlu1 %v991_v13, %s1929_s18 }
 0x1fc   : > { %v1749_v17 = vpop.f32.mrb[6].mxu0 }
 0x1fd   : > { %v947_v21 = vmul.f32 %v1749_v17, %v2292_v39  ;;  %v924_v29 = vpop.f32.mrb[7].mxu0  ;;  %v2388_v30 = vld [vmem:[#allocation3 + $0x60] sm:$0xff] }
 0x1fe   : > { %v946_v31 = vmul.f32 %v2292_v39, %v924_v29  ;;  %1287 = vrot.lane.b32.xlu1 %v999_v16, %s2616_s13  ;;  %1135 = vrot.lane.b32.xlu0 %v2388_v30, %s1927_s17  ;;  %v1017_v34 = vld [vmem:[#allocation3 + $0x61] sm:$0xff]  ;;  %v993_v37 = vld [vmem:[#allocation3 + $0x51] sm:$0xff] }
 0x1ff   : > { %v962_v32 = vadd.f32 %v2297_v42, %v947_v21  ;;  %v1002_v36 = vld [vmem:[#allocation3 + $0x62] sm:$0xff]  ;;  %v1001_v38 = vld [vmem:[#allocation3 + $0x52] sm:$0xff] }
 0x200   : > { %v961_v33 = vadd.f32 %v2297_v42, %v946_v31  ;;  %v2407_v39 = vld [vmem:[#allocation3 + $0x50] sm:$0xff] }
 0x201   : > { %v970_v61 = vmax.f32 %v962_v32, 0.0 }
 0x202   : > { %v969_v35 = vmax.f32 %v961_v33, 0.0  ;;  %1167 = vrot.lane.b32.xlu1 %v1017_v34, %s1929_s18  ;;  %1073 = vrot.lane.b32.xlu0 %v1017_v34, %s1923_s22 }
 0x203   : > { %979 = vst.msk [vmem:[#allocation3 + $0x81] sm:$0xff] %vm731_vm6, %v970_v61 }
 0x204   : > { %978 = vst.msk [vmem:[#allocation3 + $0x71] sm:$0xff] %vm731_vm6, %v969_v35 }
 0x206   : > { %1105 = vrot.lane.b32.xlu1 %v1002_v36, %s1925_s29  ;;  %1199 = vrot.lane.b32.xlu0 %v1002_v36, %s1932_s14 }
 0x20a   : > { %1229 = vrot.lane.b32.xlu1 %v2388_v30, %s2614_s16  ;;  %1071 = vrot.lane.b32.xlu0 %v993_v37, %s1923_s22  ;;  %v1011_v41 = vld [vmem:[#allocation3 + $0x80] sm:$0xff] }
 0x20b   : > { %v1027_v42 = vld [vmem:[#allocation3 + $0x82] sm:$0xff]  ;;  %v2423_v5 = vld [vmem:[#allocation3 + $0x70] sm:$0xff] }
 0x20c   : > { %v1019_v43 = vld [vmem:[#allocation3 + $0x81] sm:$0xff]  ;;  %v1018_v40 = vld [vmem:[#allocation3 + $0x71] sm:$0xff] }
 0x20d   : > { %v1026_v46 = vld [vmem:[#allocation3 + $0x72] sm:$0xff] }
 0x20e   : > { %1261 = vrot.lane.b32.xlu1 %v1017_v34, %s2615_s23  ;;  %1103 = vrot.lane.b32.xlu0 %v1001_v38, %s1925_s29 }
 0x212   : > { %1293 = vrot.lane.b32.xlu1 %v1002_v36, %s2616_s13  ;;  %1227 = vrot.lane.b32.xlu0 %v2407_v39, %s2614_s16 }
 0x216   : > { %1133 = vrot.lane.b32.xlu1 %v2407_v39, %s1927_s17  ;;  %1259 = vrot.lane.b32.xlu0 %v993_v37, %s2615_s23 }
 0x21a   : > { %1165 = vrot.lane.b32.xlu1 %v993_v37, %s1929_s18  ;;  %1197 = vrot.lane.b32.xlu0 %v1001_v38, %s1932_s14 }
 0x21e   : > { %1291 = vrot.lane.b32.xlu1 %v1001_v38, %s2616_s13  ;;  %1139 = vrot.lane.b32.xlu0 %v1011_v41, %s1927_s17 }
 0x222   : > { %1203 = vrot.lane.b32.xlu1 %v1027_v42, %s1932_s14  ;;  %1171 = vrot.lane.b32.xlu0 %v1019_v43, %s1929_s18 }
 0x226   : > { %1233 = vrot.lane.b32.xlu0 %v1011_v41, %s2614_s16  ;;  %1137 = vrot.lane.b32.xlu1 %v2423_v5, %s1927_s17 }
 0x22a   : > { %1265 = vrot.lane.b32.xlu0 %v1019_v43, %s2615_s23  ;;  %1169 = vrot.lane.b32.xlu1 %v1018_v40, %s1929_s18 }
 0x22e   : > { %1201 = vrot.lane.b32.xlu1 %v1026_v46, %s1932_s14  ;;  %1075 = vrot.lane.b32.xlu0 %v1018_v40, %s1923_s22 }
 0x22f   : > { %v1160_v55 = vpop.permute.xlu0 %1159 }
 0x230   : > { %v1128_v50 = vpop.permute.xlu1 %1127 }
 0x232   : > { %1107 = vrot.lane.b32.xlu0 %v1026_v46, %s1925_s29  ;;  %1299 = vrot.lane.b32.xlu1 %v1052_v48, %s2616_s13 }
 0x233   : > { %v1192_v57 = vpop.permute.xlu0 %1191 }
 0x234   : > { %v1066_v53 = vpop.permute.xlu1 %1065 }
 0x235   : > { %v1311_v31 = vsel %vm731_vm6, %v2305_v49, %v1066_v53 }
 0x236   : > { %1231 = vrot.lane.b32.xlu0 %v2423_v5, %s2614_s16 }
 0x237   : > { %v1126_v63 = vpop.permute.xlu0 %1125 }
 0x238   : > { %v1098_v54 = vpop.permute.xlu1 %1097  ;;  %v1325_v62 = vsel %vm767_vm10, %v1317_v2, %v1126_v63 }
 0x239   : > { %v1319_v32 = vsel %vm749_vm8, %v1311_v31, %v1098_v54 }
 0x23a   : > { %1263 = vrot.lane.b32.xlu0 %v1018_v40, %s2615_s23  ;;  %s2545_s23 = scalar_lea.hbm %s2604_s7, %s1697_s21 }
 0x23b   : > { %v1158_v3 = vpop.permute.xlu0 %1157 }
 0x23c   : > { %v1222_v56 = vpop.permute.xlu1 %1221  ;;  %v1333_v6 = vsel %vm785_vm12, %v1325_v62, %v1158_v3 }
 0x23e   : > { %1295 = vrot.lane.b32.xlu0 %v1026_v46, %s2616_s13 }
 0x240   : > { %v1254_v58 = vpop.permute.xlu1 %1253 }
 0x242   : > { %1297 = vrot.lane.b32.xlu0 %v1027_v42, %s2616_s13  ;;  %s1934_s13 = smov [#allocation4]  }
 0x243   : > { %s1861_s29 = sshll.u32 %s1934_s13, 4  ;;  %s1862_s29 = int_to_ptr.vmem [resolvable:$false] %s1861_s29 }
 0x244   : > { %v1286_v59 = vpop.permute.xlu1 %1285  ;;  %s1863_s17 = scalar_lea.vmem %s1862_s29, 2048  ;;  %p1864_p1 = scmp.lt.s32.totalorder %s2547_s19, %s1862_s29 }
 0x245   : > { %p1865_p2 = scmp.lt.s32.totalorder %s1863_s17, %s1857_s15 }
 0x247   : > { %p1866_p3 = por %p1865_p2, %p1864_p1 }
 0x248   : > { %v1064_v1 = vpop.permute.xlu1 %1063 }
 0x249   : > { %v1310_v25 = vsel %vm731_vm6, %v2312_v51, %v1064_v1  ;;  %p1867_p4 = pnand %p1866_p3, %p1860_p0 }
 0x24c   : > { %v1096_v4 = vpop.permute.xlu1 %1095 }
 0x24d   : > { %v1318_v28 = vsel %vm749_vm8, %v1310_v25, %v1096_v4 }
 0x24e   : > { %v1326_v17 = vsel %vm767_vm10, %v1318_v28, %v1128_v50 }
 0x24f   : > { %v1132_v8 = vpop.permute.xlu0 %1131  ;;  %v1334_v33 = vsel %vm785_vm12, %v1326_v17, %v1160_v55 }
 0x250   : > { %v1190_v7 = vpop.permute.xlu1 %1189  ;;  %v1343_v36 = vsel %vm1341_vm14, %v1334_v33, %v1192_v57 }
 0x251   : > { %v1342_v9 = vsel %vm1341_vm14, %v1333_v6, %v1190_v7 }
 0x252   : > { %v1351_v10 = vsel %vm1350_vm15, %v1342_v9, %v1222_v56 }
 0x253   : > { %v1360_v13 = vsel %vm1359_vm0, %v1351_v10, %v1254_v58  ;;  %v1070_v12 = vpop.permute.xlu0 %1069 }
 0x254   : > { %v1164_v15 = vpop.permute.xlu1 %1163  ;;  %v1369_v14 = vsel %vm1368_vm1, %v1360_v13, %v1286_v59  ;;  %v1313_v3 = vsel %vm731_vm6, %v2330_v0, %v1070_v12 }
 0x255   : > { %1768 = vmatprep.mubr.msk.f32.mxu1 %vm1386_vm2, %v1369_v14 }
 0x257   : > { %v1196_v18 = vpop.permute.xlu0 %1195 }
 0x258   : > { %v1102_v16 = vpop.permute.xlu1 %1101 }
 0x259   : > { %v1321_v4 = vsel %vm749_vm8, %v1313_v3, %v1102_v16 }
 0x25b   : > { %v1068_v20 = vpop.permute.xlu0 %1067 }
 0x25c   : > { %v1226_v19 = vpop.permute.xlu1 %1225  ;;  %v1312_v58 = vsel %vm731_vm6, %v2373_v24, %v1068_v20 }
 0x25f   : > { %v1100_v23 = vpop.permute.xlu0 %1099 }
 0x260   : > { %v1258_v22 = vpop.permute.xlu1 %1257  ;;  %v1320_v63 = vsel %vm749_vm8, %v1312_v58, %v1100_v23 }
 0x261   : > { %v1328_v1 = vsel %vm767_vm10, %v1320_v63, %v1132_v8 }
 0x262   : > { %v1336_v62 = vsel %vm785_vm12, %v1328_v1, %v1164_v15 }
 0x263   : > { %v1224_v27 = vpop.permute.xlu0 %1223  ;;  %v1345_v10 = vsel %vm1341_vm14, %v1336_v62, %v1196_v18 }
 0x264   : > { %v1290_v26 = vpop.permute.xlu1 %1289  ;;  %v1352_v38 = vsel %vm1350_vm15, %v1343_v36, %v1224_v27 }
 0x267   : > { %v1256_v29 = vpop.permute.xlu0 %1255 }
 0x268   : > { %v1130_v21 = vpop.permute.xlu1 %1129  ;;  %v1361_v49 = vsel %vm1359_vm0, %v1352_v38, %v1256_v29 }
 0x269   : > { %v1327_v61 = vsel %vm767_vm10, %v1319_v32, %v1130_v21 }
 0x26b   : > { %v1194_v35 = vpop.permute.xlu0 %1193 }
 0x26c   : > { %v1162_v34 = vpop.permute.xlu1 %1161 }
 0x26d   : > { %v1335_v51 = vsel %vm785_vm12, %v1327_v61, %v1162_v34 }
 0x26e   : > { %v1344_v37 = vsel %vm1341_vm14, %v1335_v51, %v1194_v35 }
 0x26f   : > { %v1353_v41 = vsel %vm1350_vm15, %v1344_v37, %v1226_v19 }
 0x270   : > { %v1288_v42 = vpop.permute.xlu1 %1287  ;;  %v1136_v43 = vpop.permute.xlu0 %1135  ;;  %v1362_v40 = vsel %vm1359_vm0, %v1353_v41, %v1258_v22 }
 0x271   : > { %v1370_v46 = vsel %vm1368_vm1, %v1361_v49, %v1288_v42  ;;  %v1371_v47 = vsel %vm1368_vm1, %v1362_v40, %v1290_v26 }
 0x272   : > { %1769 = vmatmul.mubr.msk.f32.vlgmr.msra.gmra.mrb[0].mxu1 %vm1386_vm2, %v1370_v46 }
 0x273   : > { %1771 = vmatprep.mubr.msk.f32.mxu1 %vm1386_vm2, %v1371_v47 }
 0x274   : > { %v1168_v48 = vpop.permute.xlu1 %1167  ;;  %v1074_v50 = vpop.permute.xlu0 %1073 }
 0x275   : > { %v1315_v35 = vsel %vm731_vm6, %v2388_v30, %v1074_v50 }
 0x278   : > { %v1106_v52 = vpop.permute.xlu1 %1105  ;;  %v1200_v53 = vpop.permute.xlu0 %1199 }
 0x27c   : > { %v1230_v54 = vpop.permute.xlu1 %1229  ;;  %v1072_v55 = vpop.permute.xlu0 %1071 }
 0x27d   : > { %v1314_v28 = vsel %vm731_vm6, %v2407_v39, %v1072_v55  ;;  %v1323_v39 = vsel %vm749_vm8, %v1315_v35, %v1106_v52 }
 0x280   : > { %v1262_v56 = vpop.permute.xlu1 %1261  ;;  %v1104_v57 = vpop.permute.xlu0 %1103 }
 0x281   : > { %v1322_v29 = vsel %vm749_vm8, %v1314_v28, %v1104_v57  ;;  %v1689_v57 = vld [vmem:[%s2602_s5] ss:$0 sm:$0xff] }
 0x282   : > { %v1330_v61 = vsel %vm767_vm10, %v1322_v29, %v1136_v43 }
 0x284   : > { %v1294_v59 = vpop.permute.xlu1 %1293  ;;  %v1228_v60 = vpop.permute.xlu0 %1227 }
 0x285   : > { %v1354_v8 = vsel %vm1350_vm15, %v1345_v10, %v1228_v60 }
 0x288   : > { %v1134_v11 = vpop.permute.xlu1 %1133  ;;  %v1260_v2 = vpop.permute.xlu0 %1259 }
 0x289   : > { %v1329_v6 = vsel %vm767_vm10, %v1321_v4, %v1134_v11  ;;  %v1363_v0 = vsel %vm1359_vm0, %v1354_v8, %v1260_v2 }
 0x28c   : > { %v1166_v7 = vpop.permute.xlu1 %1165  ;;  %v1198_v9 = vpop.permute.xlu0 %1197 }
 0x28d   : > { %v1337_v24 = vsel %vm785_vm12, %v1329_v6, %v1166_v7 }
 0x28e   : > { %v1346_v13 = vsel %vm1341_vm14, %v1337_v24, %v1198_v9 }
 0x28f   : > { %v1355_v14 = vsel %vm1350_vm15, %v1346_v13, %v1230_v54 }
 0x290   : > { %v1292_v12 = vpop.permute.xlu1 %1291  ;;  %v1140_v16 = vpop.permute.xlu0 %1139  ;;  %v1364_v15 = vsel %vm1359_vm0, %v1355_v14, %v1262_v56 }
 0x291   : > { %v1372_v19 = vsel %vm1368_vm1, %v1363_v0, %v1292_v12  ;;  %v1373_v20 = vsel %vm1368_vm1, %v1364_v15, %v1294_v59 }
 0x292   : > { %1772 = vmatmul.mubr.msk.f32.gmra.mrb[2].mxu1 %vm1386_vm2, %v1372_v19 }
 0x293   : > { %1774 = vmatprep.mubr.msk.f32.mxu1 %vm1386_vm2, %v1373_v20 }
 0x294   : > { %v1172_v18 = vpop.permute.xlu0 %1171  ;;  %v1204_v23 = vpop.permute.xlu1 %1203 }
 0x298   : > { %v1234_v22 = vpop.permute.xlu0 %1233  ;;  %v1138_v26 = vpop.permute.xlu1 %1137 }
 0x299   : > { %v1331_v37 = vsel %vm767_vm10, %v1323_v39, %v1138_v26 }
 0x29c   : > { %v1266_v25 = vpop.permute.xlu0 %1265  ;;  %v1170_v31 = vpop.permute.xlu1 %1169 }
 0x29d   : > { %v1339_v41 = vsel %vm785_vm12, %v1331_v37, %v1170_v31 }
 0x2a0   : > { %v1076_v27 = vpop.permute.xlu0 %1075  ;;  %v1202_v36 = vpop.permute.xlu1 %1201 }
 0x2a1   : > { %v1316_v17 = vsel %vm731_vm6, %v2423_v5, %v1076_v27  ;;  %v1338_v5 = vsel %vm785_vm12, %v1330_v61, %v1168_v48  ;;  %v1348_v42 = vsel %vm1341_vm14, %v1339_v41, %v1202_v36 }
 0x2a2   : > { %v1347_v43 = vsel %vm1341_vm14, %v1338_v5, %v1200_v53  ;;  %v1357_v48 = vsel %vm1350_vm15, %v1348_v42, %v1234_v22 }
 0x2a3   : > { %v1366_v53 = vsel %vm1359_vm0, %v1357_v48, %v1266_v25 }
 0x2a4   : > { %v1108_v21 = vpop.permute.xlu0 %1107  ;;  %v1300_v52 = vpop.permute.xlu1 %1299 }
 0x2a5   : > { %v1324_v32 = vsel %vm749_vm8, %v1316_v17, %v1108_v21 }
 0x2a6   : > { %v1332_v33 = vsel %vm767_vm10, %v1324_v32, %v1140_v16 }
 0x2a7   : > { %v1340_v51 = vsel %vm785_vm12, %v1332_v33, %v1172_v18 }
 0x2a8   : > { %v1232_v34 = vpop.permute.xlu0 %1231  ;;  %v1349_v49 = vsel %vm1341_vm14, %v1340_v51, %v1204_v23 }
 0x2a9   : > { %v1356_v30 = vsel %vm1350_vm15, %v1347_v43, %v1232_v34  ;;  %v1358_v40 = vsel %vm1350_vm15, %v1349_v49, %v2421_v45 }
 0x2aa   : > { %v1367_v54 = vsel %vm1359_vm0, %v1358_v40, %v2430_v44  ;;  %v1690_v44 = vld [vmem:[%s2603_s6] ss:$0 sm:$0xff] }
 0x2ab   : > { %v1376_v56 = vsel %vm1368_vm1, %v1367_v54, %v1300_v52 }
 0x2ac   : > { %v1264_v38 = vpop.permute.xlu0 %1263 }
 0x2ad   : > { %v1365_v46 = vsel %vm1359_vm0, %v1356_v30, %v1264_v38 }
 0x2b0   : > { %v1296_v47 = vpop.permute.xlu0 %1295 }
 0x2b1   : > { %v1374_v50 = vsel %vm1368_vm1, %v1365_v46, %v1296_v47 }
 0x2b2   : > { %1775 = vmatmul.mubr.msk.f32.gmra.mrb[4].mxu1 %vm1386_vm2, %v1374_v50 }
 0x2b4   : > { %v1298_v55 = vpop.permute.xlu0 %1297 }
 0x2b5   : > { %v1375_v45 = vsel %vm1368_vm1, %v1366_v53, %v1298_v55 }
 0x2b6   : > { %1777 = vmatprep.mubr.msk.f32.mxu1 %vm1386_vm2, %v1375_v45 }
 0x2b7   : > { %1778 = vmatmul.mubr.msk.f32.gmra.mrb[6].mxu1 %vm1386_vm2, %v1376_v56 }
 0x345   : > { %v1770_v58 = vpop.f32.mrb[0].mxu1 }
 0x346   : > { %v1524_v59 = vmul.f32 %v1770_v58, %v1689_v57  ;;  %v1477_v60 = vpop.f32.mrb[1].mxu1 }
 0x347   : > { %v1523_v63 = vmul.f32 %v1689_v57, %v1477_v60 }
 0x348   : > { %v1539_v1 = vadd.f32 %v1690_v44, %v1524_v59 }
 0x349   : > { %v1538_v11 = vadd.f32 %v1690_v44, %v1523_v63 }
 0x34a   : > { %v1547_v2 = vmax.f32 %v1539_v1, 0.0 }
 0x34b   : > { %v1546_v3 = vmax.f32 %v1538_v11, 0.0 }
 0x34c   : > { %1555 = vst.msk [vmem:[%s2034_s20 + $0x8] sm:$0xff] %vm731_vm6, %v1547_v2 }
 0x34d   : > { %1554 = vst.msk [vmem:[%s2034_s20] sm:$0xff] %vm731_vm6, %v1546_v3 }
 0x365   : > { %v1773_v4 = vpop.f32.mrb[2].mxu1 }
 0x366   : > { %v1526_v62 = vmul.f32 %v1773_v4, %v1689_v57  ;;  %v1487_v6 = vpop.f32.mrb[3].mxu1 }
 0x367   : > { %v1525_v7 = vmul.f32 %v1689_v57, %v1487_v6 }
 0x368   : > { %v1541_v9 = vadd.f32 %v1690_v44, %v1526_v62 }
 0x369   : > { %v1540_v24 = vadd.f32 %v1690_v44, %v1525_v7 }
 0x36a   : > { %v1549_v10 = vmax.f32 %v1541_v9, 0.0 }
 0x36b   : > { %v1548_v13 = vmax.f32 %v1540_v24, 0.0 }
 0x36c   : > { %1557 = vst.msk [vmem:[%s2034_s20 + $0x18] sm:$0xff] %vm731_vm6, %v1549_v10 }
 0x36d   : > { %1556 = vst.msk [vmem:[%s2034_s20 + $0x10] sm:$0xff] %vm731_vm6, %v1548_v13 }
 0x385   : > { %v1776_v8 = vpop.f32.mrb[4].mxu1 }
 0x386   : > { %v1528_v14 = vmul.f32 %v1776_v8, %v1689_v57  ;;  %v1497_v0 = vpop.f32.mrb[5].mxu1 }
 0x387   : > { %v1527_v12 = vmul.f32 %v1689_v57, %v1497_v0 }
 0x388   : > { %v1543_v16 = vadd.f32 %v1690_v44, %v1528_v14 }
 0x389   : > { %v1542_v15 = vadd.f32 %v1690_v44, %v1527_v12 }
 0x38a   : > { %v1551_v19 = vmax.f32 %v1543_v16, 0.0  ;;  %v1779_v20 = vpop.f32.mrb[6].mxu1 }
 0x38b   : > { %v1550_v18 = vmax.f32 %v1542_v15, 0.0  ;;  %v1530_v22 = vmul.f32 %v1779_v20, %v1689_v57  ;;  %v1507_v23 = vpop.f32.mrb[7].mxu1 }
 0x38c   : > { %1559 = vst.msk [vmem:[%s2034_s20 + $0x28] sm:$0xff] %vm731_vm6, %v1551_v19  ;;  %v1529_v25 = vmul.f32 %v1689_v57, %v1507_v23 }
 0x38d   : > { %1558 = vst.msk [vmem:[%s2034_s20 + $0x20] sm:$0xff] %vm731_vm6, %v1550_v18  ;;  %v1545_v26 = vadd.f32 %v1690_v44, %v1530_v22 }
 0x38e   : > { %v1544_v27 = vadd.f32 %v1690_v44, %v1529_v25 }
 0x38f   : > { %v1553_v28 = vmax.f32 %v1545_v26, 0.0 }
 0x390   : > { %v1552_v17 = vmax.f32 %v1544_v27, 0.0 }
 0x391   : > { %1561 = vst.msk [vmem:[%s2034_s20 + $0x38] sm:$0xff] %vm731_vm6, %v1553_v28 }
 0x392   : > { %1560 = vst.msk [vmem:[%s2034_s20 + $0x30] sm:$0xff] %vm731_vm6, %v1552_v17 }
 0x393   : > { %1870 = shalt.err (!%p1867_p4)
}
 0x394   : > { %s1871_s20 = scalar_lea.hbm %s2545_s23, 1024  ;;  %s1875_s21 = scalar_lea.hbm %s2604_s7, 2048 }
 0x395   : > { %p1872_p7 = scmp.ne.s32.totalorder %s2545_s23, %s1871_s20  ;;  %p1876_p10 = scmp.lt.u32.totalorder %s2545_s23, %s2604_s7 }
 0x396   : > { %p1877_p11 = scmp.lt.u32.totalorder %s1875_s21, %s1871_s20  ;;  %p1879_p13 = scmp.lt.u32.totalorder %s1871_s20, %s2545_s23 }
 0x397   : > { %p1873_p8 = pnand %p1872_p7, %p2014_p5 }
 0x398   : > { %p1878_p12 = por %p1877_p11, %p1876_p10 }
 0x399   : > { %p1874_p9 = pneg %p1873_p8 }
 0x39a   : > { %p1880_p0 = por %p1879_p13, %p1878_p12 }
 0x39c   : > { %p1881_p1 = pnand %p1880_p0, %p1874_p9 }
 0x39e   : > { %1884 = shalt.err (!%p1881_p1)
}
 0x39f   : > { %s1935_s28 = smov 128  }
 0x3a0   : > { %1804 = dma.vmem_to_hbm [thread:$0]  (%p2014_p5), %s2547_s19, 1024, %s2545_s23, %s2555_s8, %s1935_s28, %s1935_s28, %s1923_s22  }
 0x3a1 PF: > { %p1810_p2 = scmp.ge.s32.totalorder %s1919_s27, 2  ;;  %s1591_s15 = sand.u32 1, %s1907_s24  }
 0x3a2   : > { %s1592_s13 = scalar_lea.sflag [#allocation5], %s1591_s15 }
 0x3a3   : > { %p1807_p3 = pnand %p1810_p2, %p2018_p6 }
 0x3a5   : > { %1902 = dma.done.wait (!%p1807_p3), %s1592_s13, 1024  }
 0x3a6   : > { %1904 = vsyncadd (!%p1807_p3), %s1592_s13, 4294966272  ;;  %p17_p4 = scmp.ge.s32.totalorder %s2001_s30, 4   ;;  %s2618_s24 = smov %s1911_s25 }
 0x3a7   : > { %s2619_s25 = smov %s1915_s26  ;;  %s2620_s26 = smov %s2012_s10 }
 0x3a8   : > { %s2621_s27 = smov %s2001_s30  ;;  %19 = sbr.rel (!%p17_p4) target bundleno = 3 (0x3), region = 94 }
 0x3af   :  { %1597 = vsyncpa [#allocation5], 1 }
 0x3b0   :  { %1599 = vsyncpa [#allocation5 + $0x1], 1 }

</bundles_post_ra>
